<compile_context>
chip_gen: v7x
topology: tpu7x:2x2x1
jax: 0.10.0
libtpu: 0.0.40
codegen_flags: <defaults>
</compile_context>

<pallas_src>
import functools

import jax
import jax.numpy as jnp
from jax.experimental import pallas as pl
from jax.experimental.pallas import tpu as pltpu

_BN_EPS = 1e-5


# ---------------------------------------------------------------------------
# Pallas kernels
# ---------------------------------------------------------------------------
def _mapping_kernel(x_ref, w_ref, o_ref):
    # x_ref: [B, D+1] (last column == 1), w_ref: [M, D+1] (last column == folded bias)
    y = jax.lax.dot_general(
        x_ref[...], w_ref[...],
        dimension_numbers=(((1,), (1,)), ((), ())),     # trans-b: contract D+1 with D+1
        preferred_element_type=jnp.float32)             # [B, M]
    o_ref[...] = jnp.where(y >= 0.0, y, 0.2 * y).astype(o_ref.dtype)   # LeakyReLU(0.2)


def _make_spatial_kernel(activation):
    # out[m, n] = sum_k W[m, k] * X[k, n]; n = flattened H*W (lane-dense).
    def kernel(x_ref, w_ref, o_ref):
        y = jnp.dot(w_ref[...], x_ref[0], preferred_element_type=jnp.float32)  # [M, N]
        if activation == "relu":
            y = jnp.maximum(y, 0.0)
        elif activation == "sigmoid":
            y = 1.0 / (1.0 + jnp.exp(-y))
        o_ref[0] = y.astype(o_ref.dtype)
    return kernel


def _spatial_matmul(x_stack, w_all, activation):
    # x_stack: [B, K, N] (N = H*W in lanes), w_all: [M, K]  ->  [B, M, N]
    B, K, N = x_stack.shape
    M = w_all.shape[0]
    return pl.pallas_call(
        _make_spatial_kernel(activation),
        out_shape=jax.ShapeDtypeStruct((B, M, N), x_stack.dtype),
        grid=(B,),
        in_specs=[
            pl.BlockSpec((1, K, N), lambda b: (b, 0, 0)),
            pl.BlockSpec((M, K), lambda b: (0, 0)),       # weight resident across batch
        ],
        out_specs=pl.BlockSpec((1, M, N), lambda b: (b, 0, 0)),
        compiler_params=pltpu.CompilerParams(dimension_semantics=("parallel",)),
    )(x_stack, w_all)


# ---------------------------------------------------------------------------
# Host-side layout glue (pure reshapes / pads / stacks; no compute hoisted)
# ---------------------------------------------------------------------------
def _shift_stack(x):
    # x: [B, C, H, W] -> [B, 9*C + 1, H*W]
    # Slot s = (dr+1)*3 + (dc+1) holds x[., ., p+dr, q+dc] (zero outside); last row = 1.
    B, C, H, W = x.shape
    xp = jnp.pad(x, ((0, 0), (0, 0), (1, 1), (1, 1)))
    shifts = [xp[:, :, 1 + dr:1 + dr + H, 1 + dc:1 + dc + W]
              for dr in (-1, 0, 1) for dc in (-1, 0, 1)]
    stacked = jnp.stack(shifts, axis=1).reshape(B, 9 * C, H * W)
    ones = jnp.ones((B, 1, H * W), x.dtype)
    return jnp.concatenate([stacked, ones], axis=1)


def _deinterleave_phases(phases, c_out, H, W):
    # phases: [B, 4*C_out, H*W] with row = (2*a + b)*C_out + oc  ->  [B, C_out, 2H, 2W]
    B = phases.shape[0]
    t = phases.reshape(B, 2, 2, c_out, H, W)      # [B, a, b, oc, p, q]
    t = t.transpose(0, 3, 4, 1, 5, 2)             # [B, oc, p, a, q, b]
    return t.reshape(B, c_out, 2 * H, 2 * W)      # (p,a)->2p+a, (q,b)->2q+b


# ---------------------------------------------------------------------------
# Host-side weight packing (done once): fold eval-mode BN, pack conv-T as matmul
# ---------------------------------------------------------------------------
def _bn_fold(gamma, beta, mean, var):
    inv = gamma / jnp.sqrt(var + _BN_EPS)
    return inv, beta - mean * inv                  # y = inv * x + shift


def pack_mapping_weight(w_lin, b_lin, bn):
    # Linear [M, D] + BN1d folded; bias as an extra column (pairs with ones column of x).
    gamma, beta, mean, var = bn
    inv, shift = _bn_fold(gamma, beta, mean, var)
    w_eff = w_lin * inv[:, None]
    b_eff = b_lin * inv + shift
    return jnp.concatenate([w_eff, b_eff[:, None]], axis=1)     # [M, D+1]


# ConvTranspose2d(k=4, s=2, p=1): output pixel (2p+a, 2q+b) takes taps
# (k_idx, input_shift) from _TAPS[a] x _TAPS[b].
_TAPS = {0: ((1, 0), (3, -1)),      # even output index
         1: ((0, 1), (2, 0))}       # odd output index


def pack_convT4_weight(w_t, b_t, bn):
    # w_t: [C_in, C_out, 4, 4] (torch ConvTranspose2d layout), BN2d folded.
    gamma, beta, mean, var = bn
    inv, shift = _bn_fold(gamma, beta, mean, var)
    w_eff = w_t * inv[None, :, None, None]
    b_eff = b_t * inv + shift
    c_in, c_out = w_t.shape[0], w_t.shape[1]
    w_all = jnp.zeros((4 * c_out, 9 * c_in + 1), w_t.dtype)
    for a in (0, 1):
        for b in (0, 1):
            ph = 2 * a + b
            for ky, dr in _TAPS[a]:
                for kx, dc in _TAPS[b]:
                    s = (dr + 1) * 3 + (dc + 1)
                    w_all = w_all.at[ph * c_out:(ph + 1) * c_out,
                                     s * c_in:(s + 1) * c_in].set(w_eff[:, :, ky, kx].T)
            w_all = w_all.at[ph * c_out:(ph + 1) * c_out, 9 * c_in].set(b_eff)
    return w_all


def pack_convT3_weight(w_t, b_t):
    # ConvTranspose2d(k=3, s=1, p=1) == correlation with spatially flipped kernel.
    c_in, c_out = w_t.shape[0], w_t.shape[1]
    w_all = jnp.zeros((c_out, 9 * c_in + 1), w_t.dtype)
    for dr in (-1, 0, 1):
        for dc in (-1, 0, 1):
            ky, kx = 1 - dr, 1 - dc
            s = (dr + 1) * 3 + (dc + 1)
            w_all = w_all.at[:, s * c_in:(s + 1) * c_in].set(w_t[:, :, ky, kx].T)
    w_all = w_all.at[:, 9 * c_in].set(b_t)
    return w_all


# ---------------------------------------------------------------------------
# Full forward pass
# ---------------------------------------------------------------------------
@jax.jit
def generator_forward(condition, noise, packed):
    map_w, up_ws, img_w = packed
    in_chans = map_w.shape[0] // 16
    B = condition.shape[0]

    # (1) concat, (2) mapping network (Linear + folded BN1d + LeakyReLU) + reshape
    x = jnp.concatenate([condition, noise], axis=1)                      # [B, D]
    x_aug = jnp.concatenate([x, jnp.ones((B, 1), x.dtype)], axis=1)      # [B, D+1]
    mapped = pl.pallas_call(
        _mapping_kernel,
        out_shape=jax.ShapeDtypeStruct((B, map_w.shape[0]), x.dtype),
    )(x_aug, map_w)
    h = mapped.reshape(B, in_chans, 4, 4)

    # (3) upsample network: 4x (ConvT k4 s2 p1 + folded BN2d + ReLU)
    for w_all in up_ws:
        _B, _C, H, W = h.shape
        c_out = w_all.shape[0] // 4
        xs = _shift_stack(h)                                  # [B, 9C+1, H*W]
        ph = _spatial_matmul(xs, w_all, "relu")               # [B, 4*C_out, H*W]
        h = _deinterleave_phases(ph, c_out, H, W)             # [B, C_out, 2H, 2W]
    out = h

    # (4) image net: ConvT k3 s1 p1 + Sigmoid
    xs = _shift_stack(out)
    img = _spatial_matmul(xs, img_w, "sigmoid")               # [B, 3, H*W]
    out_image = img.reshape(B, img_w.shape[0], out.shape[2], out.shape[3])
    return out, out_image


# ---------------------------------------------------------------------------
# Pure-JAX reference (same eval-mode BN semantics) for verification
# ---------------------------------------------------------------------------
def _ref_convT(x, w_t, b, stride, padding):
    k = w_t.shape[2]
    w_conv = jnp.flip(w_t, axis=(2, 3)).transpose(1, 0, 2, 3)   # [C_out, C_in, k, k]
    pad = k - 1 - padding
    y = jax.lax.conv_general_dilated(
        x, w_conv, window_strides=(1, 1), padding=[(pad, pad), (pad, pad)],
        lhs_dilation=(stride, stride),
        dimension_numbers=("NCHW", "OIHW", "NCHW"))
    return y + b[None, :, None, None]


def _ref_bn(y, bn):
    gamma, beta, mean, var = bn
    shp = (1, -1, 1, 1) if y.ndim == 4 else (1, -1)
    return ((y - mean.reshape(shp)) / jnp.sqrt(var.reshape(shp) + _BN_EPS)
            * gamma.reshape(shp) + beta.reshape(shp))


def reference_forward(condition, noise, params):
    (w_lin, b_lin, bn1), conv_params, (w_img, b_img) = params
    x = jnp.concatenate([condition, noise], axis=1)
    y = x @ w_lin.T + b_lin
    y = _ref_bn(y, bn1)
    y = jnp.where(y >= 0, y, 0.2 * y)
    in_chans = w_lin.shape[0] // 16
    h = y.reshape(-1, in_chans, 4, 4)
    for (w_t, b_t, bn) in conv_params:
        h = _ref_convT(h, w_t, b_t, stride=2, padding=1)
        h = jnp.maximum(_ref_bn(h, bn), 0.0)
    img = _ref_convT(h, w_img, b_img, stride=1, padding=1)
    return h, 1.0 / (1.0 + jnp.exp(-img))


if __name__ == "__main__":
    in_chans = 32            # Ng (divisible by 16); final feature channels = 2
    proj_dim, noise_dim = 16, 16
    input_dim = proj_dim + noise_dim
    batch = 2

    keys = iter(jax.random.split(jax.random.PRNGKey(0), 64))
    nxt = lambda: next(keys)

    condition = jax.random.normal(nxt(), (batch, proj_dim), dtype=jnp.float32)
    noise = jax.random.normal(nxt(), (batch, noise_dim), dtype=jnp.float32)

    def make_bn(c):
        gamma = jax.random.uniform(nxt(), (c,), minval=0.5, maxval=1.5, dtype=jnp.float32)
        beta = 0.1 * jax.random.normal(nxt(), (c,), dtype=jnp.float32)
        mean = 0.1 * jax.random.normal(nxt(), (c,), dtype=jnp.float32)
        var = jax.random.uniform(nxt(), (c,), minval=0.5, maxval=1.5, dtype=jnp.float32)
        return (gamma, beta, mean, var)

    # mapping network params: Linear(input_dim -> in_chans*16) + BN1d
    m_out = in_chans * 16
    w_lin = (1.0 / jnp.sqrt(input_dim)) * jax.random.normal(
        nxt(), (m_out, input_dim), dtype=jnp.float32)
    b_lin = 0.1 * jax.random.normal(nxt(), (m_out,), dtype=jnp.float32)
    bn1 = make_bn(m_out)

    # 4 upsample stages: channels Ng -> Ng/2 -> Ng/4 -> Ng/8 -> Ng/16
    chans = [in_chans, in_chans // 2, in_chans // 4, in_chans // 8, in_chans // 16]
    conv_params = []
    for li in range(4):
        c_in, c_out = chans[li], chans[li + 1]
        w_t = (1.0 / jnp.sqrt(c_in * 16)) * jax.random.normal(
            nxt(), (c_in, c_out, 4, 4), dtype=jnp.float32)
        b_t = 0.1 * jax.random.normal(nxt(), (c_out,), dtype=jnp.float32)
        conv_params.append((w_t, b_t, make_bn(c_out)))

    # image extractor: ConvT(Ng/16 -> 3, k=3, s=1, p=1) + Sigmoid
    c_img_in = chans[-1]
    w_img = (1.0 / jnp.sqrt(c_img_in * 9)) * jax.random.normal(
        nxt(), (c_img_in, 3, 3, 3), dtype=jnp.float32)
    b_img = 0.1 * jax.random.normal(nxt(), (3,), dtype=jnp.float32)

    # host-side packing (BN folded, bias via ones-row column)
    map_w = pack_mapping_weight(w_lin, b_lin, bn1)
    up_ws = tuple(pack_convT4_weight(w_t, b_t, bn) for (w_t, b_t, bn) in conv_params)
    img_w_all = pack_convT3_weight(w_img, b_img)

    out, out_image = generator_forward(condition, noise, (map_w, up_ws, img_w_all))
    out = jax.block_until_ready(out)
    out_image = jax.block_until_ready(out_image)

    assert out.shape == (batch, in_chans // 16, 64, 64)
    assert out_image.shape == (batch, 3, 64, 64)

    ref_out, ref_img = reference_forward(
        condition, noise, ((w_lin, b_lin, bn1), conv_params, (w_img, b_img)))
    assert jnp.allclose(out, ref_out, atol=2e-4, rtol=2e-4), \
        float(jnp.max(jnp.abs(out - ref_out)))
    assert jnp.allclose(out_image, ref_img, atol=2e-4, rtol=2e-4), \
        float(jnp.max(jnp.abs(out_image - ref_img)))

    print("KERNEL_OK")
</pallas_src>

<mosaic_0001>
module attributes {stable_mosaic.version = 11 : i64} {
  func.func @_mapping_kernel(%arg0: memref<2x33xf32, #tpu.memory_space<vmem>>, %arg1: memref<512x33xf32, #tpu.memory_space<vmem>>, %arg2: memref<2x512xf32, #tpu.memory_space<vmem>>) attributes {dimension_semantics = [], scalar_prefetch = 0 : i64, scratch_operands = 0 : i64, tpu.core_type = #tpu.core_type<tc>} {
    %c0 = arith.constant 0 : index
    %c0_0 = arith.constant 0 : index
    %0 = vector.load %arg0[%c0, %c0_0] : memref<2x33xf32, #tpu.memory_space<vmem>>, vector<2x33xf32>
    %c0_1 = arith.constant 0 : index
    %c0_2 = arith.constant 0 : index
    %1 = vector.load %arg1[%c0_1, %c0_2] : memref<512x33xf32, #tpu.memory_space<vmem>>, vector<512x33xf32>
    %cst = arith.constant dense<0.000000e+00> : vector<2x512xf32>
    %2 = tpu.matmul %0, %1, %cst {dimension_numbers = #tpu.dot_dimension_numbers<[1], [1], [0], [0], [0, 0, 1, 0], [], []>} : vector<2x33xf32>, vector<512x33xf32>, vector<2x512xf32> -> vector<2x512xf32>
    %cst_3 = arith.constant 0.000000e+00 : f32
    %3 = vector.broadcast %cst_3 : f32 to vector<2x512xf32>
    %4 = arith.cmpf oge, %2, %3 : vector<2x512xf32>
    %cst_4 = arith.constant 2.000000e-01 : f32
    %5 = vector.broadcast %cst_4 : f32 to vector<2x512xf32>
    %6 = arith.mulf %5, %2 : vector<2x512xf32>
    %7 = arith.select %4, %2, %6 : vector<2x512xi1>, vector<2x512xf32>
    %c0_5 = arith.constant 0 : index
    %c0_6 = arith.constant 0 : index
    %8 = vector.load %arg2[%c0_5, %c0_6] : memref<2x512xf32, #tpu.memory_space<vmem>>, vector<2x512xf32>
    tpu.vector_store %arg2[%c0_5, %c0_6], %7 {strides = array<i32>} : memref<2x512xf32, #tpu.memory_space<vmem>>, vector<2x512xf32>,
    return
  }
}

module attributes {stable_mosaic.version = 11 : i64} {
  func.func @kernel(%arg0: i32, %arg1: memref<1x289x16xf32, #tpu.memory_space<vmem>>, %arg2: memref<64x289xf32, #tpu.memory_space<vmem>>, %arg3: memref<1x64x16xf32, #tpu.memory_space<vmem>>) attributes {dimension_semantics = [#tpu.dimension_semantics<parallel>], iteration_bounds = array<i64: 2>, scalar_prefetch = 0 : i64, scratch_operands = 0 : i64, tpu.core_type = #tpu.core_type<tc>, window_params = [{transform_indices = @transform_0, window_bounds = array<i64: 1, 289, 16>}, {pipeline_mode = #tpu.pipeline_mode<synchronous>, transform_indices = @transform_1, window_bounds = array<i64: 64, 289>}, {transform_indices = @transform_2, window_bounds = array<i64: 1, 64, 16>}]} {
    %c0 = arith.constant 0 : index
    %c0_0 = arith.constant 0 : index
    %0 = vector.load %arg2[%c0, %c0_0] : memref<64x289xf32, #tpu.memory_space<vmem>>, vector<64x289xf32>
    %c0_1 = arith.constant 0 : index
    %c0_2 = arith.constant 0 : index
    %c0_3 = arith.constant 0 : index
    %1 = vector.load %arg1[%c0_1, %c0_2, %c0_3] : memref<1x289x16xf32, #tpu.memory_space<vmem>>, vector<1x289x16xf32>
    %2 = vector.shape_cast %1 : vector<1x289x16xf32> to vector<289x16xf32>
    %cst = arith.constant dense<0.000000e+00> : vector<64x16xf32>
    %3 = tpu.matmul %0, %2, %cst {dimension_numbers = #tpu.dot_dimension_numbers<[1], [0], [0], [1], [0, 0, 1, 1], [], []>} : vector<64x289xf32>, vector<289x16xf32>, vector<64x16xf32> -> vector<64x16xf32>
    %cst_4 = arith.constant 0.000000e+00 : f32
    %4 = vector.broadcast %cst_4 : f32 to vector<64x16xf32>
    %5 = arith.maximumf %3, %4 : vector<64x16xf32>
    %c0_5 = arith.constant 0 : index
    %c0_6 = arith.constant 0 : index
    %c0_7 = arith.constant 0 : index
    %6 = vector.load %arg3[%c0_5, %c0_6, %c0_7] : memref<1x64x16xf32, #tpu.memory_space<vmem>>, vector<1x64x16xf32>
    %7 = vector.shape_cast %6 : vector<1x64x16xf32> to vector<64x16xf32>
    %8 = vector.shape_cast %5 : vector<64x16xf32> to vector<1x64x16xf32>
    tpu.vector_store %arg3[%c0_5, %c0_6, %c0_7], %8 {strides = array<i32>} : memref<1x64x16xf32, #tpu.memory_space<vmem>>, vector<1x64x16xf32>,
    return
  }
  func.func @transform_0(%arg0: i32) -> (i32, i32, i32) {
    %c0_i32 = arith.constant 0 : i32
    %c0_i32_0 = arith.constant 0 : i32
    %c0_i32_1 = arith.constant 0 : i32
    return %arg0, %c0_i32, %c0_i32_0 : i32, i32, i32
  }
  func.func @transform_1(%arg0: i32) -> (i32, i32) {
    %c0_i32 = arith.constant 0 : i32
    %c0_i32_0 = arith.constant 0 : i32
    %c0_i32_1 = arith.constant 0 : i32
    return %c0_i32, %c0_i32_0 : i32, i32
  }
  func.func @transform_2(%arg0: i32) -> (i32, i32, i32) {
    %c0_i32 = arith.constant 0 : i32
    %c0_i32_0 = arith.constant 0 : i32
    %c0_i32_1 = arith.constant 0 : i32
    return %arg0, %c0_i32, %c0_i32_0 : i32, i32, i32
  }
}

module attributes {stable_mosaic.version = 11 : i64} {
  func.func @kernel(%arg0: i32, %arg1: memref<1x145x64xf32, #tpu.memory_space<vmem>>, %arg2: memref<32x145xf32, #tpu.memory_space<vmem>>, %arg3: memref<1x32x64xf32, #tpu.memory_space<vmem>>) attributes {dimension_semantics = [#tpu.dimension_semantics<parallel>], iteration_bounds = array<i64: 2>, scalar_prefetch = 0 : i64, scratch_operands = 0 : i64, tpu.core_type = #tpu.core_type<tc>, window_params = [{transform_indices = @transform_0, window_bounds = array<i64: 1, 145, 64>}, {pipeline_mode = #tpu.pipeline_mode<synchronous>, transform_indices = @transform_1, window_bounds = array<i64: 32, 145>}, {transform_indices = @transform_2, window_bounds = array<i64: 1, 32, 64>}]} {
    %c0 = arith.constant 0 : index
    %c0_0 = arith.constant 0 : index
    %0 = vector.load %arg2[%c0, %c0_0] : memref<32x145xf32, #tpu.memory_space<vmem>>, vector<32x145xf32>
    %c0_1 = arith.constant 0 : index
    %c0_2 = arith.constant 0 : index
    %c0_3 = arith.constant 0 : index
    %1 = vector.load %arg1[%c0_1, %c0_2, %c0_3] : memref<1x145x64xf32, #tpu.memory_space<vmem>>, vector<1x145x64xf32>
    %2 = vector.shape_cast %1 : vector<1x145x64xf32> to vector<145x64xf32>
    %cst = arith.constant dense<0.000000e+00> : vector<32x64xf32>
    %3 = tpu.matmul %0, %2, %cst {dimension_numbers = #tpu.dot_dimension_numbers<[1], [0], [0], [1], [0, 0, 1, 1], [], []>} : vector<32x145xf32>, vector<145x64xf32>, vector<32x64xf32> -> vector<32x64xf32>
    %cst_4 = arith.constant 0.000000e+00 : f32
    %4 = vector.broadcast %cst_4 : f32 to vector<32x64xf32>
    %5 = arith.maximumf %3, %4 : vector<32x64xf32>
    %c0_5 = arith.constant 0 : index
    %c0_6 = arith.constant 0 : index
    %c0_7 = arith.constant 0 : index
    %6 = vector.load %arg3[%c0_5, %c0_6, %c0_7] : memref<1x32x64xf32, #tpu.memory_space<vmem>>, vector<1x32x64xf32>
    %7 = vector.shape_cast %6 : vector<1x32x64xf32> to vector<32x64xf32>
    %8 = vector.shape_cast %5 : vector<32x64xf32> to vector<1x32x64xf32>
    tpu.vector_store %arg3[%c0_5, %c0_6, %c0_7], %8 {strides = array<i32>} : memref<1x32x64xf32, #tpu.memory_space<vmem>>, vector<1x32x64xf32>,
    return
  }
  func.func @transform_0(%arg0: i32) -> (i32, i32, i32) {
    %c0_i32 = arith.constant 0 : i32
    %c0_i32_0 = arith.constant 0 : i32
    %c0_i32_1 = arith.constant 0 : i32
    return %arg0, %c0_i32, %c0_i32_0 : i32, i32, i32
  }
  func.func @transform_1(%arg0: i32) -> (i32, i32) {
    %c0_i32 = arith.constant 0 : i32
    %c0_i32_0 = arith.constant 0 : i32
    %c0_i32_1 = arith.constant 0 : i32
    return %c0_i32, %c0_i32_0 : i32, i32
  }
  func.func @transform_2(%arg0: i32) -> (i32, i32, i32) {
    %c0_i32 = arith.constant 0 : i32
    %c0_i32_0 = arith.constant 0 : i32
    %c0_i32_1 = arith.constant 0 : i32
    return %arg0, %c0_i32, %c0_i32_0 : i32, i32, i32
  }
}

module attributes {stable_mosaic.version = 11 : i64} {
  func.func @kernel(%arg0: i32, %arg1: memref<1x73x256xf32, #tpu.memory_space<vmem>>, %arg2: memref<16x73xf32, #tpu.memory_space<vmem>>, %arg3: memref<1x16x256xf32, #tpu.memory_space<vmem>>) attributes {dimension_semantics = [#tpu.dimension_semantics<parallel>], iteration_bounds = array<i64: 2>, scalar_prefetch = 0 : i64, scratch_operands = 0 : i64, tpu.core_type = #tpu.core_type<tc>, window_params = [{transform_indices = @transform_0, window_bounds = array<i64: 1, 73, 256>}, {pipeline_mode = #tpu.pipeline_mode<synchronous>, transform_indices = @transform_1, window_bounds = array<i64: 16, 73>}, {transform_indices = @transform_2, window_bounds = array<i64: 1, 16, 256>}]} {
    %c0 = arith.constant 0 : index
    %c0_0 = arith.constant 0 : index
    %0 = vector.load %arg2[%c0, %c0_0] : memref<16x73xf32, #tpu.memory_space<vmem>>, vector<16x73xf32>
    %c0_1 = arith.constant 0 : index
    %c0_2 = arith.constant 0 : index
    %c0_3 = arith.constant 0 : index
    %1 = vector.load %arg1[%c0_1, %c0_2, %c0_3] : memref<1x73x256xf32, #tpu.memory_space<vmem>>, vector<1x73x256xf32>
    %2 = vector.shape_cast %1 : vector<1x73x256xf32> to vector<73x256xf32>
    %cst = arith.constant dense<0.000000e+00> : vector<16x256xf32>
    %3 = tpu.matmul %0, %2, %cst {dimension_numbers = #tpu.dot_dimension_numbers<[1], [0], [0], [1], [0, 0, 1, 1], [], []>} : vector<16x73xf32>, vector<73x256xf32>, vector<16x256xf32> -> vector<16x256xf32>
    %cst_4 = arith.constant 0.000000e+00 : f32
    %4 = vector.broadcast %cst_4 : f32 to vector<16x256xf32>
    %5 = arith.maximumf %3, %4 : vector<16x256xf32>
    %c0_5 = arith.constant 0 : index
    %c0_6 = arith.constant 0 : index
    %c0_7 = arith.constant 0 : index
    %6 = vector.load %arg3[%c0_5, %c0_6, %c0_7] : memref<1x16x256xf32, #tpu.memory_space<vmem>>, vector<1x16x256xf32>
    %7 = vector.shape_cast %6 : vector<1x16x256xf32> to vector<16x256xf32>
    %8 = vector.shape_cast %5 : vector<16x256xf32> to vector<1x16x256xf32>
    tpu.vector_store %arg3[%c0_5, %c0_6, %c0_7], %8 {strides = array<i32>} : memref<1x16x256xf32, #tpu.memory_space<vmem>>, vector<1x16x256xf32>,
    return
  }
  func.func @transform_0(%arg0: i32) -> (i32, i32, i32) {
    %c0_i32 = arith.constant 0 : i32
    %c0_i32_0 = arith.constant 0 : i32
    %c0_i32_1 = arith.constant 0 : i32
    return %arg0, %c0_i32, %c0_i32_0 : i32, i32, i32
  }
  func.func @transform_1(%arg0: i32) -> (i32, i32) {
    %c0_i32 = arith.constant 0 : i32
    %c0_i32_0 = arith.constant 0 : i32
    %c0_i32_1 = arith.constant 0 : i32
    return %c0_i32, %c0_i32_0 : i32, i32
  }
  func.func @transform_2(%arg0: i32) -> (i32, i32, i32) {
    %c0_i32 = arith.constant 0 : i32
    %c0_i32_0 = arith.constant 0 : i32
    %c0_i32_1 = arith.constant 0 : i32
    return %arg0, %c0_i32, %c0_i32_0 : i32, i32, i32
  }
}

module attributes {stable_mosaic.version = 11 : i64} {
  func.func @kernel(%arg0: i32, %arg1: memref<1x37x1024xf32, #tpu.memory_space<vmem>>, %arg2: memref<8x37xf32, #tpu.memory_space<vmem>>, %arg3: memref<1x8x1024xf32, #tpu.memory_space<vmem>>) attributes {dimension_semantics = [#tpu.dimension_semantics<parallel>], iteration_bounds = array<i64: 2>, scalar_prefetch = 0 : i64, scratch_operands = 0 : i64, tpu.core_type = #tpu.core_type<tc>, window_params = [{transform_indices = @transform_0, window_bounds = array<i64: 1, 37, 1024>}, {pipeline_mode = #tpu.pipeline_mode<synchronous>, transform_indices = @transform_1, window_bounds = array<i64: 8, 37>}, {transform_indices = @transform_2, window_bounds = array<i64: 1, 8, 1024>}]} {
    %c0 = arith.constant 0 : index
    %c0_0 = arith.constant 0 : index
    %0 = vector.load %arg2[%c0, %c0_0] : memref<8x37xf32, #tpu.memory_space<vmem>>, vector<8x37xf32>
    %c0_1 = arith.constant 0 : index
    %c0_2 = arith.constant 0 : index
    %c0_3 = arith.constant 0 : index
    %1 = vector.load %arg1[%c0_1, %c0_2, %c0_3] : memref<1x37x1024xf32, #tpu.memory_space<vmem>>, vector<1x37x1024xf32>
    %2 = vector.shape_cast %1 : vector<1x37x1024xf32> to vector<37x1024xf32>
    %cst = arith.constant dense<0.000000e+00> : vector<8x1024xf32>
    %3 = tpu.matmul %0, %2, %cst {dimension_numbers = #tpu.dot_dimension_numbers<[1], [0], [0], [1], [0, 0, 1, 1], [], []>} : vector<8x37xf32>, vector<37x1024xf32>, vector<8x1024xf32> -> vector<8x1024xf32>
    %cst_4 = arith.constant 0.000000e+00 : f32
    %4 = vector.broadcast %cst_4 : f32 to vector<8x1024xf32>
    %5 = arith.maximumf %3, %4 : vector<8x1024xf32>
    %c0_5 = arith.constant 0 : index
    %c0_6 = arith.constant 0 : index
    %c0_7 = arith.constant 0 : index
    %6 = vector.load %arg3[%c0_5, %c0_6, %c0_7] : memref<1x8x1024xf32, #tpu.memory_space<vmem>>, vector<1x8x1024xf32>
    %7 = vector.shape_cast %6 : vector<1x8x1024xf32> to vector<8x1024xf32>
    %8 = vector.shape_cast %5 : vector<8x1024xf32> to vector<1x8x1024xf32>
    tpu.vector_store %arg3[%c0_5, %c0_6, %c0_7], %8 {strides = array<i32>} : memref<1x8x1024xf32, #tpu.memory_space<vmem>>, vector<1x8x1024xf32>,
    return
  }
  func.func @transform_0(%arg0: i32) -> (i32, i32, i32) {
    %c0_i32 = arith.constant 0 : i32
    %c0_i32_0 = arith.constant 0 : i32
    %c0_i32_1 = arith.constant 0 : i32
    return %arg0, %c0_i32, %c0_i32_0 : i32, i32, i32
  }
  func.func @transform_1(%arg0: i32) -> (i32, i32) {
    %c0_i32 = arith.constant 0 : i32
    %c0_i32_0 = arith.constant 0 : i32
    %c0_i32_1 = arith.constant 0 : i32
    return %c0_i32, %c0_i32_0 : i32, i32
  }
  func.func @transform_2(%arg0: i32) -> (i32, i32, i32) {
    %c0_i32 = arith.constant 0 : i32
    %c0_i32_0 = arith.constant 0 : i32
    %c0_i32_1 = arith.constant 0 : i32
    return %arg0, %c0_i32, %c0_i32_0 : i32, i32, i32
  }
}

module attributes {stable_mosaic.version = 11 : i64} {
  func.func @kernel(%arg0: i32, %arg1: memref<1x19x4096xf32, #tpu.memory_space<vmem>>, %arg2: memref<3x19xf32, #tpu.memory_space<vmem>>, %arg3: memref<1x3x4096xf32, #tpu.memory_space<vmem>>) attributes {dimension_semantics = [#tpu.dimension_semantics<parallel>], iteration_bounds = array<i64: 2>, scalar_prefetch = 0 : i64, scratch_operands = 0 : i64, tpu.core_type = #tpu.core_type<tc>, window_params = [{transform_indices = @transform_0, window_bounds = array<i64: 1, 19, 4096>}, {pipeline_mode = #tpu.pipeline_mode<synchronous>, transform_indices = @transform_1, window_bounds = array<i64: 3, 19>}, {transform_indices = @transform_2, window_bounds = array<i64: 1, 3, 4096>}]} {
    %c0 = arith.constant 0 : index
    %c0_0 = arith.constant 0 : index
    %0 = vector.load %arg2[%c0, %c0_0] : memref<3x19xf32, #tpu.memory_space<vmem>>, vector<3x19xf32>
    %c0_1 = arith.constant 0 : index
    %c0_2 = arith.constant 0 : index
    %c0_3 = arith.constant 0 : index
    %1 = vector.load %arg1[%c0_1, %c0_2, %c0_3] : memref<1x19x4096xf32, #tpu.memory_space<vmem>>, vector<1x19x4096xf32>
    %2 = vector.shape_cast %1 : vector<1x19x4096xf32> to vector<19x4096xf32>
    %cst = arith.constant dense<0.000000e+00> : vector<3x4096xf32>
    %3 = tpu.matmul %0, %2, %cst {dimension_numbers = #tpu.dot_dimension_numbers<[1], [0], [0], [1], [0, 0, 1, 1], [], []>} : vector<3x19xf32>, vector<19x4096xf32>, vector<3x4096xf32> -> vector<3x4096xf32>
    %cst_4 = arith.constant 0.000000e+00 : f32
    %4 = vector.broadcast %cst_4 : f32 to vector<3x4096xf32>
    %5 = arith.subf %4, %3 : vector<3x4096xf32>
    %6 = math.exp %5 : vector<3x4096xf32>
    %cst_5 = arith.constant 1.000000e+00 : f32
    %7 = vector.broadcast %cst_5 : f32 to vector<3x4096xf32>
    %8 = arith.addf %7, %6 : vector<3x4096xf32>
    %cst_6 = arith.constant 1.000000e+00 : f32
    %9 = vector.broadcast %cst_6 : f32 to vector<3x4096xf32>
    %10 = arith.divf %9, %8 : vector<3x4096xf32>
    %c0_7 = arith.constant 0 : index
    %c0_8 = arith.constant 0 : index
    %c0_9 = arith.constant 0 : index
    %11 = vector.load %arg3[%c0_7, %c0_8, %c0_9] : memref<1x3x4096xf32, #tpu.memory_space<vmem>>, vector<1x3x4096xf32>
    %12 = vector.shape_cast %11 : vector<1x3x4096xf32> to vector<3x4096xf32>
    %13 = vector.shape_cast %10 : vector<3x4096xf32> to vector<1x3x4096xf32>
    tpu.vector_store %arg3[%c0_7, %c0_8, %c0_9], %13 {strides = array<i32>} : memref<1x3x4096xf32, #tpu.memory_space<vmem>>, vector<1x3x4096xf32>,
    return
  }
  func.func @transform_0(%arg0: i32) -> (i32, i32, i32) {
    %c0_i32 = arith.constant 0 : i32
    %c0_i32_0 = arith.constant 0 : i32
    %c0_i32_1 = arith.constant 0 : i32
    return %arg0, %c0_i32, %c0_i32_0 : i32, i32, i32
  }
  func.func @transform_1(%arg0: i32) -> (i32, i32) {
    %c0_i32 = arith.constant 0 : i32
    %c0_i32_0 = arith.constant 0 : i32
    %c0_i32_1 = arith.constant 0 : i32
    return %c0_i32, %c0_i32_0 : i32, i32
  }
  func.func @transform_2(%arg0: i32) -> (i32, i32, i32) {
    %c0_i32 = arith.constant 0 : i32
    %c0_i32_0 = arith.constant 0 : i32
    %c0_i32_1 = arith.constant 0 : i32
    return %arg0, %c0_i32, %c0_i32_0 : i32, i32, i32
  }
}

</mosaic_0001>

<bundles_post_ra>
// kernel: generator_forward.6
= control target key start
LH: loop header
LB: loop body
LE: loop exit
PB: predicated region body
PF: predicated region fallthrough
CT: control target
= control target key end

     0   :  { %vm76_vm0 = vcmask 269312   ;;  %s978_s1 = inlined_call_operand.vmem [shape: f32[512,33], index: 1, kind: input, shape index: {}]   ;;  %s979_s0 = inlined_call_operand.vmem [shape: f32[2,33], index: 0, kind: input, shape index: {}]   ;;  %s980_s2 = inlined_call_operand.vmem [shape: f32[2,512], index: 2, kind: output, shape index: {}]  }
   0x1   :  { %v28_v0 = vld [vmem:[%s978_s1 + $0x80] sm:$0xff]  ;;  %v29_v1 = vld [vmem:[%s978_s1 + $0x88] sm:$0xff]  ;;  %vm708_vm1 = vmpackc.low %vm76_vm0, %vm76_vm0 }
   0x2   :  { %v587_v3 = vpack.c.bf16 %v29_v1, %v28_v0  ;;  %v60_v4 = vld [vmem:[%s978_s1 + $0x180] sm:$0xff]  ;;  %v61_v5 = vld [vmem:[%s978_s1 + $0x188] sm:$0xff]  ;;  %v30_v13 = vld [vmem:[%s978_s1 + $0x90] sm:$0xff] }
   0x3   :  { %v12_v6 = vld [vmem:[%s978_s1] sm:$0xff]  ;;  %v635_v7 = vpack.c.bf16 %v61_v5, %v60_v4  ;;  %v13_v8 = vld [vmem:[%s978_s1 + $0x8] sm:$0xff]  ;;  %v31_v14 = vld [vmem:[%s978_s1 + $0x98] sm:$0xff] }
   0x4   :  { %v44_v9 = vld [vmem:[%s978_s1 + $0x100] sm:$0xff]  ;;  %v45_v10 = vld [vmem:[%s978_s1 + $0x108] sm:$0xff]  ;;  %589 = vmatprep.subr.msk.bf16.mxu0 %vm708_vm1, %v587_v3  ;;  %v590_v11 = vpack.c.bf16 %v13_v8, %v12_v6  ;;  %v62_v15 = vld [vmem:[%s978_s1 + $0x190] sm:$0xff]  ;;  %v593_v16 = vpack.c.bf16 %v31_v14, %v30_v13 }
   0x5   :  { %v638_v12 = vpack.c.bf16 %v45_v10, %v44_v9  ;;  %637 = vmatprep.subr.msk.bf16.mxu1 %vm708_vm1, %v635_v7  ;;  %v63_v17 = vld [vmem:[%s978_s1 + $0x198] sm:$0xff]  ;;  %v14_v19 = vld [vmem:[%s978_s1 + $0x10] sm:$0xff]  ;;  %v32_v23 = vld [vmem:[%s978_s1 + $0xa0] sm:$0xff] }
   0x6   :  { %592 = vmatpush3.bf16.xpose.msk.msra.mxu0 %vm708_vm1, %v590_v11  ;;  %v641_v18 = vpack.c.bf16 %v63_v17, %v62_v15  ;;  %v15_v20 = vld [vmem:[%s978_s1 + $0x18] sm:$0xff]  ;;  %v46_v21 = vld [vmem:[%s978_s1 + $0x110] sm:$0xff]  ;;  %v33_v24 = vld [vmem:[%s978_s1 + $0xa8] sm:$0xff] }
   0x7   :  { %640 = vmatpush3.bf16.xpose.msk.msra.mxu1 %vm708_vm1, %v638_v12  ;;  %595 = vmatprep.subr.msk.bf16.mxu0 %vm708_vm1, %v593_v16  ;;  %v47_v22 = vld [vmem:[%s978_s1 + $0x118] sm:$0xff]  ;;  %v64_v25 = vld [vmem:[%s978_s1 + $0x1a0] sm:$0xff]  ;;  %v65_v26 = vld [vmem:[%s978_s1 + $0x1a8] sm:$0xff]  ;;  %v596_v27 = vpack.c.bf16 %v15_v20, %v14_v19  ;;  %v599_v29 = vpack.c.bf16 %v33_v24, %v32_v23 }
   0x8   :  { %643 = vmatprep.subr.msk.bf16.mxu1 %vm708_vm1, %v641_v18  ;;  %v644_v28 = vpack.c.bf16 %v47_v22, %v46_v21  ;;  %v647_v30 = vpack.c.bf16 %v65_v26, %v64_v25  ;;  %v16_v31 = vld [vmem:[%s978_s1 + $0x20] sm:$0xff]  ;;  %v17_v32 = vld [vmem:[%s978_s1 + $0x28] sm:$0xff]  ;;  %v34_v35 = vld [vmem:[%s978_s1 + $0xb0] sm:$0xff] }
   0x9   :  { %v48_v33 = vld [vmem:[%s978_s1 + $0x120] sm:$0xff]  ;;  %v49_v34 = vld [vmem:[%s978_s1 + $0x128] sm:$0xff]  ;;  %v35_v36 = vld [vmem:[%s978_s1 + $0xb8] sm:$0xff]  ;;  %v602_v39 = vpack.c.bf16 %v17_v32, %v16_v31 }
   0xa   :  { %v66_v37 = vld [vmem:[%s978_s1 + $0x1b0] sm:$0xff]  ;;  %v67_v38 = vld [vmem:[%s978_s1 + $0x1b8] sm:$0xff]  ;;  %v650_v40 = vpack.c.bf16 %v49_v34, %v48_v33  ;;  %v605_v41 = vpack.c.bf16 %v35_v36, %v34_v35  ;;  %v823_v45 = vld [vmem:[%s979_s0] sm:$0x3]  ;;  %v684_v35 = vmov 1983009808  }
   0xb   :  { %v653_v42 = vpack.c.bf16 %v67_v38, %v66_v37  ;;  %v18_v43 = vld [vmem:[%s978_s1 + $0x30] sm:$0xff]  ;;  %v19_v44 = vld [vmem:[%s978_s1 + $0x38] sm:$0xff]  ;;  %v36_v48 = vld [vmem:[%s978_s1 + $0xc0] sm:$0xff]  ;;  %551 = vmatprep.mubr.msk.f32.mxu0 %vm76_vm0, %v823_v45  ;;  %585 = vmatprep.mubr.msk.f32.mxu1 %vm76_vm0, %v823_v45  ;;  %v433_v36 = vunpack.c.l.s4 %v684_v35  ;;  %v435_v37 = vlaneseq }
   0xc   :  { %v50_v46 = vld [vmem:[%s978_s1 + $0x130] sm:$0xff]  ;;  %v51_v47 = vld [vmem:[%s978_s1 + $0x138] sm:$0xff]  ;;  %v37_v49 = vld [vmem:[%s978_s1 + $0xc8] sm:$0xff]  ;;  %v608_v52 = vpack.c.bf16 %v19_v44, %v18_v43 }
   0xd   :  { %v68_v50 = vld [vmem:[%s978_s1 + $0x1c0] sm:$0xff]  ;;  %v69_v51 = vld [vmem:[%s978_s1 + $0x1c8] sm:$0xff]  ;;  %v656_v53 = vpack.c.bf16 %v51_v47, %v50_v46  ;;  %v611_v54 = vpack.c.bf16 %v37_v49, %v36_v48  ;;  %v38_v60 = vld [vmem:[%s978_s1 + $0xd0] sm:$0xff] }
   0xe   :  { %598 = vmatpush3.bf16.xpose.msk.msra.mxu0 %vm708_vm1, %v596_v27  ;;  %v659_v55 = vpack.c.bf16 %v69_v51, %v68_v50  ;;  %v20_v56 = vld [vmem:[%s978_s1 + $0x40] sm:$0xff]  ;;  %v21_v57 = vld [vmem:[%s978_s1 + $0x48] sm:$0xff]  ;;  %v39_v61 = vld [vmem:[%s978_s1 + $0xd8] sm:$0xff] }
   0xf   :  { %646 = vmatpush3.bf16.xpose.msk.msra.mxu1 %vm708_vm1, %v644_v28  ;;  %601 = vmatprep.subr.msk.bf16.mxu0 %vm708_vm1, %v599_v29  ;;  %v52_v58 = vld [vmem:[%s978_s1 + $0x140] sm:$0xff]  ;;  %v53_v59 = vld [vmem:[%s978_s1 + $0x148] sm:$0xff]  ;;  %v70_v62 = vld [vmem:[%s978_s1 + $0x1d0] sm:$0xff]  ;;  %v614_v0 = vpack.c.bf16 %v21_v57, %v20_v56  ;;  %v617_v3 = vpack.c.bf16 %v39_v61, %v38_v60 }
  0x10   :  { %649 = vmatprep.subr.msk.bf16.mxu1 %vm708_vm1, %v647_v30  ;;  %v71_v63 = vld [vmem:[%s978_s1 + $0x1d8] sm:$0xff]  ;;  %v662_v1 = vpack.c.bf16 %v53_v59, %v52_v58  ;;  %v22_v5 = vld [vmem:[%s978_s1 + $0x50] sm:$0xff]  ;;  %v40_v9 = vld [vmem:[%s978_s1 + $0xe0] sm:$0xff] }
  0x11   :  { %v665_v4 = vpack.c.bf16 %v71_v63, %v70_v62  ;;  %v23_v6 = vld [vmem:[%s978_s1 + $0x58] sm:$0xff]  ;;  %v54_v7 = vld [vmem:[%s978_s1 + $0x150] sm:$0xff]  ;;  %v41_v10 = vld [vmem:[%s978_s1 + $0xe8] sm:$0xff] }
  0x12   :  { %v55_v8 = vld [vmem:[%s978_s1 + $0x158] sm:$0xff]  ;;  %v72_v11 = vld [vmem:[%s978_s1 + $0x1e0] sm:$0xff]  ;;  %v73_v12 = vld [vmem:[%s978_s1 + $0x1e8] sm:$0xff]  ;;  %v620_v13 = vpack.c.bf16 %v23_v6, %v22_v5  ;;  %v623_v15 = vpack.c.bf16 %v41_v10, %v40_v9 }
  0x13   :  { %v668_v14 = vpack.c.bf16 %v55_v8, %v54_v7  ;;  %v671_v16 = vpack.c.bf16 %v73_v12, %v72_v11  ;;  %v24_v17 = vld [vmem:[%s978_s1 + $0x60] sm:$0xff]  ;;  %v25_v18 = vld [vmem:[%s978_s1 + $0x68] sm:$0xff]  ;;  %v42_v21 = vld [vmem:[%s978_s1 + $0xf0] sm:$0xff] }
  0x14   :  { %v56_v19 = vld [vmem:[%s978_s1 + $0x160] sm:$0xff]  ;;  %v57_v20 = vld [vmem:[%s978_s1 + $0x168] sm:$0xff]  ;;  %v43_v22 = vld [vmem:[%s978_s1 + $0xf8] sm:$0xff]  ;;  %v626_v25 = vpack.c.bf16 %v25_v18, %v24_v17 }
  0x15   :  { %v74_v23 = vld [vmem:[%s978_s1 + $0x1f0] sm:$0xff]  ;;  %v75_v24 = vld [vmem:[%s978_s1 + $0x1f8] sm:$0xff]  ;;  %v674_v26 = vpack.c.bf16 %v57_v20, %v56_v19  ;;  %v629_v27 = vpack.c.bf16 %v43_v22, %v42_v21 }
  0x16   :  { %604 = vmatpush3.bf16.xpose.msk.msra.mxu0 %vm708_vm1, %v602_v39  ;;  %v677_v28 = vpack.c.bf16 %v75_v24, %v74_v23  ;;  %v26_v29 = vld [vmem:[%s978_s1 + $0x70] sm:$0xff]  ;;  %v27_v30 = vld [vmem:[%s978_s1 + $0x78] sm:$0xff] }
  0x17   :  { %652 = vmatpush3.bf16.xpose.msk.msra.mxu1 %vm708_vm1, %v650_v40  ;;  %607 = vmatprep.subr.msk.bf16.mxu0 %vm708_vm1, %v605_v41  ;;  %v58_v31 = vld [vmem:[%s978_s1 + $0x170] sm:$0xff]  ;;  %v59_v32 = vld [vmem:[%s978_s1 + $0x178] sm:$0xff]  ;;  %v632_v33 = vpack.c.bf16 %v27_v30, %v26_v29  ;;  %v434_v40 = vunpack.c.0.s8 %v433_v36  ;;  %v436_v41 = vshrl.u32 %v435_v37, 7 }
  0x18   :  { %655 = vmatprep.subr.msk.bf16.mxu1 %vm708_vm1, %v653_v42  ;;  %v680_v34 = vpack.c.bf16 %v59_v32, %v58_v31 }
  0x19   :  { %v437_v49 = vsub.s32 %v434_v40, %v436_v41 }
  0x1e   :  { %610 = vmatpush3.bf16.xpose.msk.msra.mxu0 %vm708_vm1, %v608_v52 }
  0x1f   :  { %658 = vmatpush3.bf16.xpose.msk.msra.mxu1 %vm708_vm1, %v656_v53  ;;  %613 = vmatprep.subr.msk.bf16.mxu0 %vm708_vm1, %v611_v54 }
  0x20   :  { %661 = vmatprep.subr.msk.bf16.mxu1 %vm708_vm1, %v659_v55 }
  0x26   :  { %616 = vmatpush3.bf16.xpose.msk.msra.mxu0 %vm708_vm1, %v614_v0 }
  0x27   :  { %664 = vmatpush3.bf16.xpose.msk.msra.mxu1 %vm708_vm1, %v662_v1  ;;  %619 = vmatprep.subr.msk.bf16.mxu0 %vm708_vm1, %v617_v3 }
  0x28   :  { %667 = vmatprep.subr.msk.bf16.mxu1 %vm708_vm1, %v665_v4 }
  0x2e   :  { %622 = vmatpush3.bf16.xpose.msk.msra.mxu0 %vm708_vm1, %v620_v13 }
  0x2f   :  { %670 = vmatpush3.bf16.xpose.msk.msra.mxu1 %vm708_vm1, %v668_v14  ;;  %625 = vmatprep.subr.msk.bf16.mxu0 %vm708_vm1, %v623_v15 }
  0x30   :  { %673 = vmatprep.subr.msk.bf16.mxu1 %vm708_vm1, %v671_v16 }
  0x36   :  { %628 = vmatpush3.bf16.xpose.msk.msra.mxu0 %vm708_vm1, %v626_v25 }
  0x37   :  { %676 = vmatpush3.bf16.xpose.msk.msra.mxu1 %vm708_vm1, %v674_v26  ;;  %631 = vmatprep.subr.msk.bf16.mxu0 %vm708_vm1, %v629_v27 }
  0x38   :  { %679 = vmatprep.subr.msk.bf16.mxu1 %vm708_vm1, %v677_v28 }
  0x3e   :  { %634 = vmatpush3.bf16.xpose.msk.msra.mxu0 %vm708_vm1, %v632_v33 }
  0x3f   :  { %682 = vmatpush3.bf16.xpose.msk.msra.mxu1 %vm708_vm1, %v680_v34 }
  0x45   :  { %552 = vmatmul.mubr.msk.f32.vlgmr.msra.gmra.mrb[0].mxu0 %vm76_vm0, %v823_v45 }
  0x46   :  { %586 = vmatmul.mubr.msk.f32.vlgmr.msra.gmra.mrb[0].mxu1 %vm76_vm0, %v823_v45 }
 0x118   :  { %v338_v38 = vpop.f32.mrb[0].mxu0 }
 0x119   :  { %v409_v39 = vpop.f32.mrb[0].mxu1  ;;  %vm414_vm2 = vcmp.ge.f32.partialorder %v338_v38, 0.0  ;;  %v418_v42 = vmul.f32 0.2, %v338_v38  ;;  %v340_v44 = vpop.f32.mrb[1].mxu0 }
 0x11a   :  { %vm416_vm3 = vcmp.ge.f32.partialorder %v409_v39, 0.0  ;;  %v420_v43 = vmul.f32 0.2, %v409_v39  ;;  %v411_v2 = vpop.f32.mrb[1].mxu1  ;;  %vm415_vm4 = vcmp.ge.f32.partialorder %v340_v44, 0.0 }
 0x11b   :  { %v422_v46 = vsel %vm414_vm2, %v338_v38, %v418_v42  ;;  %v419_v47 = vmul.f32 0.2, %v340_v44  ;;  %vm417_vm5 = vcmp.ge.f32.partialorder %v411_v2, 0.0  ;;  %v421_v45 = vmul.f32 0.2, %v411_v2 }
 0x11c   :  { %v424_v48 = vsel %vm416_vm3, %v409_v39, %v420_v43 }
 0x11d   :  { %v423_v50 = vsel %vm415_vm4, %v340_v44, %v419_v47  ;;  %v425_v52 = vsel %vm417_vm5, %v411_v2, %v421_v45 }
 0x11e   :  { %v430_v51 = vcombine.low %v422_v46, %v423_v50  ;;  %v431_v53 = vcombine.low %v424_v48, %v425_v52 }
 0x120   :  { %v438_v54 = vrot.slane %v430_v51, %v437_v49  ;;  %v445_v55 = vrot.slane %v431_v53, %v437_v49 }
 0x122   :  { %v446_v56 = vcombine.low %v438_v54, %v445_v55 }
 0x124   :  { %448 = vst [vmem:[%s980_s2] sm:$0xff] %v446_v56 }

// kernel: generator_forward.7
= control target key start
LH: loop header
LB: loop body
LE: loop exit
PB: predicated region body
PF: predicated region fallthrough
CT: control target
= control target key end

     0   :  { %s699_s9 = smov 0   ;;  %s859_s0 = inlined_call_operand.vmem [shape: f32[2,289,16], index: 0, kind: input, shape index: {}]   ;;  %s860_s1 = inlined_call_operand.vmem [shape: f32[64,289], index: 1, kind: input, shape index: {}]   ;;  %s861_s2 = inlined_call_operand.vmem [shape: f32[2,64,16], index: 2, kind: output, shape index: {}]  }
   0x1 LB: > { %s516_s10 = sadd.s32 4294967295, %s682_s9   ;;  %p520_p0 = scmp.ge.s32.totalorder %s682_s9, 1  ;;  %s682_s9 = sphi %s699_s9, %s12_s9  }
   0x2   : > { %p112_p1 = scmp.lt.s32.totalorder %s682_s9, 3 }
   0x4   : > { %p113_p2 = pnand %p520_p0, %p112_p1 }
   0x5   : > { %p134_p3 = scmp.lt.s32.totalorder (!%p113_p2), %s516_s10, 1  ;;  %v145_v0 = vld [vmem:[%s860_s1 + $0x8] sm:$0xff] (!%p113_p2)  ;;  %v146_v1 = vld [vmem:[%s860_s1 + $0x10] sm:$0xff] (!%p113_p2)  ;;  %vm205_vm0 = vcmask (!%p113_p2), 269312   ;;  %vm230_vm1 = vcmask (!%p113_p2), 1040384   ;;  %v152_v48 = vld [vmem:[%s860_s1 + $0x40] sm:$0xff] (!%p113_p2) }
   0x6   : > { %116 = sbr.rel (%p113_p2) target bundleno = 300 (0x12c), region = 28  ;;  %298 = vmatprep.mubr.f32.mxu0 (!%p113_p2), %v145_v0  ;;  %615 = vmatprep.mubr.msk.f32.mxu1 (!%p113_p2), %vm205_vm0, %v146_v1  ;;  %v149_v46 = vld [vmem:[%s860_s1 + $0x28] sm:$0xff] (!%p113_p2)  ;;  %v155_v54 = vld [vmem:[%s860_s1 + $0x58] sm:$0xff] (!%p113_p2)  ;;  %v158_v56 = vld [vmem:[%s860_s1 + $0x70] sm:$0xff] (!%p113_p2)  ;;  %vm452_vm2 = vcmask (!%p113_p2), 130048  }
   0x7   : > { %v161_v60 = vld [vmem:[%s860_s1 + $0x88] sm:$0xff] (!%p113_p2)  ;;  %v164_v62 = vld [vmem:[%s860_s1 + $0xa0] sm:$0xff] (!%p113_p2)  ;;  %v167_v63 = vld [vmem:[%s860_s1 + $0xb8] sm:$0xff] (!%p113_p2) }
   0x8   : > { %v144_v0 = vld [vmem:[%s860_s1] sm:$0xff] (!%p113_p2) }
   0x9   : > { %v148_v1 = vld [vmem:[%s860_s1 + $0x20] sm:$0xff] (!%p113_p2) }
   0xd   : > { %s863_s10 = smov (!%p134_p3, %s516_s10), 1 }
   0xe   : > { %s667_s15 = smul.u32 296, %s863_s10  ;;  %s535_s11 = sshll.u32 %s863_s10, 6 }
   0xf   : > { %s838_s14 = scalar_lea.vmem %s861_s2, %s535_s11 }
  0x10   : > { %s720_s18 = scalar_lea.vmem %s859_s0, %s667_s15 }
  0x11   : > { %v184_v2 = vld [vmem:[%s720_s18 + $0x80] sm:$0xff]  ;;  %v185_v3 = vld [vmem:[%s720_s18 + $0x88] sm:$0xff]  ;;  %v186_v7 = vld [vmem:[%s720_s18 + $0x90] sm:$0xff] }
  0x12   : > { %v168_v4 = vld [vmem:[%s720_s18] sm:$0xff]  ;;  %v627_v5 = vpack.c.bf16 %v185_v3, %v184_v2  ;;  %v169_v6 = vld [vmem:[%s720_s18 + $0x8] sm:$0xff]  ;;  %v187_v8 = vld [vmem:[%s720_s18 + $0x98] sm:$0xff] }
  0x13   : > { %v629_v9 = vpack.c.bf16 %v169_v6, %v168_v4  ;;  %v631_v10 = vpack.c.bf16 %v187_v8, %v186_v7  ;;  %v170_v11 = vld [vmem:[%s720_s18 + $0x10] sm:$0xff]  ;;  %v171_v12 = vld [vmem:[%s720_s18 + $0x18] sm:$0xff]  ;;  %v188_v13 = vld [vmem:[%s720_s18 + $0xa0] sm:$0xff] }
  0x14   : > { %628 = vmatprep.subr.bf16.mxu0 %v627_v5  ;;  %v189_v14 = vld [vmem:[%s720_s18 + $0xa8] sm:$0xff]  ;;  %v633_v15 = vpack.c.bf16 %v171_v12, %v170_v11  ;;  %v172_v17 = vld [vmem:[%s720_s18 + $0x20] sm:$0xff]  ;;  %v190_v19 = vld [vmem:[%s720_s18 + $0xb0] sm:$0xff] }
  0x15   : > { %630 = vmatpush3.bf16.msra.mxu0 %v629_v9  ;;  %v635_v16 = vpack.c.bf16 %v189_v14, %v188_v13  ;;  %v173_v18 = vld [vmem:[%s720_s18 + $0x28] sm:$0xff]  ;;  %v191_v20 = vld [vmem:[%s720_s18 + $0xb8] sm:$0xff]  ;;  %v200_v22 = vld [vmem:[%s720_s18 + $0x100] sm:$0xff] }
  0x16   : > { %632 = vmatprep.subr.bf16.mxu0 %v631_v10  ;;  %v637_v21 = vpack.c.bf16 %v173_v18, %v172_v17  ;;  %v639_v23 = vpack.c.bf16 %v191_v20, %v190_v19  ;;  %v174_v24 = vld [vmem:[%s720_s18 + $0x30] sm:$0xff]  ;;  %v175_v25 = vld [vmem:[%s720_s18 + $0x38] sm:$0xff]  ;;  %v201_v26 = vld [vmem:[%s720_s18 + $0x108] sm:$0xff] }
  0x17   : > { %v192_v27 = vld [vmem:[%s720_s18 + $0xc0] sm:$0xff]  ;;  %v193_v28 = vld [vmem:[%s720_s18 + $0xc8] sm:$0xff]  ;;  %v659_v29 = vpack.c.bf16 %v201_v26, %v200_v22  ;;  %v202_v30 = vld [vmem:[%s720_s18 + $0x110] sm:$0xff]  ;;  %v641_v32 = vpack.c.bf16 %v175_v25, %v174_v24 }
  0x18   : > { %v203_v31 = vld [vmem:[%s720_s18 + $0x118] sm:$0xff]  ;;  %v643_v34 = vpack.c.bf16 %v193_v28, %v192_v27  ;;  %v176_v35 = vld [vmem:[%s720_s18 + $0x40] sm:$0xff]  ;;  %v177_v36 = vld [vmem:[%s720_s18 + $0x48] sm:$0xff] }
  0x19   : > { %634 = vmatpush3.bf16.msra.mxu0 %v633_v15  ;;  %660 = vmatprep.subr.bf16.mxu1 %v659_v29  ;;  %v663_v33 = vpack.c.bf16 %v203_v31, %v202_v30  ;;  %v194_v37 = vld [vmem:[%s720_s18 + $0xd0] sm:$0xff]  ;;  %v195_v38 = vld [vmem:[%s720_s18 + $0xd8] sm:$0xff]  ;;  %v204_v39 = vld [vmem:[%s720_s18 + $0x120] sm:$0x1]  ;;  %v645_v40 = vpack.c.bf16 %v177_v36, %v176_v35 }
  0x1a   : > { %636 = vmatprep.subr.bf16.mxu0 %v635_v16  ;;  %662 = vmatpush3.bf16.msra.mxu1 %v659_v29  ;;  %v647_v41 = vpack.c.bf16 %v195_v38, %v194_v37  ;;  %v178_v42 = vld [vmem:[%s720_s18 + $0x50] sm:$0xff]  ;;  %v179_v43 = vld [vmem:[%s720_s18 + $0x58] sm:$0xff]  ;;  %v196_v44 = vld [vmem:[%s720_s18 + $0xe0] sm:$0xff] }
  0x1b   : > { %664 = vmatprep.subr.bf16.mxu1 %v663_v33  ;;  %v197_v45 = vld [vmem:[%s720_s18 + $0xe8] sm:$0xff]  ;;  %v649_v47 = vpack.c.bf16 %v179_v43, %v178_v42  ;;  %v180_v50 = vld [vmem:[%s720_s18 + $0x60] sm:$0xff]  ;;  %v198_v52 = vld [vmem:[%s720_s18 + $0xf0] sm:$0xff] }
  0x1c   : > { %v651_v49 = vpack.c.bf16 %v197_v45, %v196_v44  ;;  %v181_v51 = vld [vmem:[%s720_s18 + $0x68] sm:$0xff]  ;;  %v199_v53 = vld [vmem:[%s720_s18 + $0xf8] sm:$0xff]  ;;  %v182_v58 = vld [vmem:[%s720_s18 + $0x70] sm:$0xff] }
  0x1d   : > { %638 = vmatpush3.bf16.msra.mxu0 %v637_v21  ;;  %v653_v55 = vpack.c.bf16 %v181_v51, %v180_v50  ;;  %v655_v57 = vpack.c.bf16 %v199_v53, %v198_v52  ;;  %v183_v59 = vld [vmem:[%s720_s18 + $0x78] sm:$0xff]  ;;  %v150_v4 = vld [vmem:[%s860_s1 + $0x30] sm:$0xff]  ;;  %v153_v6 = vld [vmem:[%s860_s1 + $0x48] sm:$0xff] }
  0x1e   : > { %640 = vmatprep.subr.bf16.mxu0 %v639_v23  ;;  %666 = vmatpush3.bf16.msra.mxu1 %v663_v33  ;;  %v657_v61 = vpack.c.bf16 %v183_v59, %v182_v58  ;;  %v147_v2 = vld [vmem:[%s860_s1 + $0x18] sm:$0xff]  ;;  %v154_v5 = vld [vmem:[%s860_s1 + $0x50] sm:$0xff]  ;;  %v157_v7 = vld [vmem:[%s860_s1 + $0x68] sm:$0xff] }
  0x1f   : > { %613 = vmatprep.subr.msk.mxu1 %vm230_vm1, %v204_v39  ;;  %v151_v3 = vld [vmem:[%s860_s1 + $0x38] sm:$0xff]  ;;  %v156_v8 = vld [vmem:[%s860_s1 + $0x60] sm:$0xff]  ;;  %v162_v12 = vld [vmem:[%s860_s1 + $0x90] sm:$0xff] }
  0x20   : > { %v160_v9 = vld [vmem:[%s860_s1 + $0x80] sm:$0xff]  ;;  %v159_v10 = vld [vmem:[%s860_s1 + $0x78] sm:$0xff]  ;;  %v166_v13 = vld [vmem:[%s860_s1 + $0xb0] sm:$0xff] }
  0x21   : > { %642 = vmatpush3.bf16.msra.mxu0 %v641_v32  ;;  %v163_v11 = vld [vmem:[%s860_s1 + $0x98] sm:$0xff]  ;;  %v165_v14 = vld [vmem:[%s860_s1 + $0xa8] sm:$0xff] }
  0x22   : > { %644 = vmatprep.subr.bf16.mxu0 %v643_v34  ;;  %614 = vmatpush3.msk.msra.mxu1 %vm230_vm1, %v204_v39 }
  0x23   : > { %616 = vmatmul.mubr.msk.f32.vlgmr.msra.gmra.mrb[0].mxu1 %vm205_vm0, %v149_v46 }
  0x24   : > { %618 = vmatprep.mubr.msk.f32.mxu1 %vm205_vm0, %v152_v48 }
  0x25   : > { %646 = vmatpush3.bf16.msra.mxu0 %v645_v40 }
  0x26   : > { %648 = vmatprep.subr.bf16.mxu0 %v647_v41 }
  0x27   : > { %619 = vmatmul.mubr.msk.f32.gmra.mrb[2].mxu1 %vm205_vm0, %v155_v54 }
  0x28   : > { %621 = vmatprep.mubr.msk.f32.mxu1 %vm205_vm0, %v158_v56 }
  0x29   : > { %650 = vmatpush3.bf16.msra.mxu0 %v649_v47 }
  0x2a   : > { %652 = vmatprep.subr.bf16.mxu0 %v651_v49 }
  0x2b   : > { %622 = vmatmul.mubr.msk.f32.gmra.mrb[4].mxu1 %vm205_vm0, %v161_v60 }
  0x2c   : > { %624 = vmatprep.mubr.msk.f32.mxu1 %vm205_vm0, %v164_v62 }
  0x2d   : > { %654 = vmatpush3.bf16.msra.mxu0 %v653_v55 }
  0x2e   : > { %656 = vmatprep.subr.bf16.mxu0 %v655_v57 }
  0x2f   : > { %625 = vmatmul.mubr.msk.f32.gmra.mrb[6].mxu1 %vm205_vm0, %v167_v63 }
  0x31   : > { %658 = vmatpush3.bf16.msra.mxu0 %v657_v61 }
  0x34   : > { %299 = vmatmul.mubr.f32.vlgmr.msra.gmra.mrb[0].mxu0 %v144_v0 }
  0x35   : > { %303 = vmatprep.mubr.f32.mxu0 %v148_v1 }
  0x38   : > { %304 = vmatmul.mubr.f32.gmra.mrb[2].mxu0 %v147_v2 }
  0x39   : > { %308 = vmatprep.mubr.f32.mxu0 %v151_v3 }
  0x3c   : > { %309 = vmatmul.mubr.f32.gmra.mrb[4].mxu0 %v150_v4 }
  0x3d   : > { %313 = vmatprep.mubr.f32.mxu0 %v154_v5 }
  0x40   : > { %314 = vmatmul.mubr.f32.gmra.mrb[6].mxu0 %v153_v6 }
  0x41   : > { %318 = vmatprep.mubr.f32.mxu0 %v157_v7 }
  0x44   : > { %319 = vmatmul.mubr.f32.gmra.mrb[8].mxu0 %v156_v8 }
  0x45   : > { %323 = vmatprep.mubr.f32.mxu0 %v160_v9 }
  0x48   : > { %324 = vmatmul.mubr.f32.gmra.mrb[10].mxu0 %v159_v10 }
  0x49   : > { %328 = vmatprep.mubr.f32.mxu0 %v163_v11 }
  0x4c   : > { %329 = vmatmul.mubr.f32.gmra.mrb[12].mxu0 %v162_v12 }
  0x4d   : > { %333 = vmatprep.mubr.f32.mxu0 %v166_v13 }
  0x50   : > { %334 = vmatmul.mubr.f32.gmra.mrb[14].mxu0 %v165_v14 }
  0xf6   : > { %v617_v15 = vpop.f32.mrb[0].mxu1 }
  0xf7   : > { %v405_v16 = vpop.f32.mrb[1].mxu1 }
  0xfa   : > { %v620_v17 = vpop.f32.mrb[2].mxu1 }
  0xfb   : > { %v415_v18 = vpop.f32.mrb[3].mxu1 }
  0xfe   : > { %v623_v19 = vpop.f32.mrb[4].mxu1 }
  0xff   : > { %v425_v20 = vpop.f32.mrb[5].mxu1 }
 0x102   : > { %v626_v21 = vpop.f32.mrb[6].mxu1 }
 0x103   : > { %v435_v23 = vpop.f32.mrb[7].mxu1 }
 0x107   : > { %v568_v22 = vpop.f32.mrb[0].mxu0 }
 0x108   : > { %v569_v24 = vpop.f32.mrb[1].mxu0 }
 0x109   : > { %v570_v25 = vadd.f32 %v569_v24, %v568_v22 }
 0x10b   : > { %v406_v26 = vadd.f32 %v570_v25, %v405_v16  ;;  %v571_v27 = vpop.f32.mrb[2].mxu0 }
 0x10c   : > { %v572_v28 = vpop.f32.mrb[3].mxu0 }
 0x10d   : > { %v444_v29 = vmax.f32 %v406_v26, 0.0  ;;  %v573_v30 = vadd.f32 %v572_v28, %v571_v27 }
 0x10f   : > { %453 = vst.msk [vmem:[%s838_s14] sm:$0xff] %vm452_vm2, %v444_v29  ;;  %v411_v31 = vadd.f32 %v617_v15, %v573_v30  ;;  %v574_v32 = vpop.f32.mrb[4].mxu0 }
 0x110   : > { %v575_v33 = vpop.f32.mrb[5].mxu0 }
 0x111   : > { %v445_v34 = vmax.f32 %v411_v31, 0.0  ;;  %v576_v35 = vadd.f32 %v575_v33, %v574_v32 }
 0x113   : > { %454 = vst.msk [vmem:[%s838_s14 + $0x8] sm:$0xff] %vm452_vm2, %v445_v34  ;;  %v416_v36 = vadd.f32 %v576_v35, %v415_v18  ;;  %v577_v37 = vpop.f32.mrb[6].mxu0 }
 0x114   : > { %v578_v38 = vpop.f32.mrb[7].mxu0 }
 0x115   : > { %v446_v39 = vmax.f32 %v416_v36, 0.0  ;;  %v579_v40 = vadd.f32 %v578_v38, %v577_v37 }
 0x117   : > { %455 = vst.msk [vmem:[%s838_s14 + $0x10] sm:$0xff] %vm452_vm2, %v446_v39  ;;  %v421_v41 = vadd.f32 %v620_v17, %v579_v40  ;;  %v580_v42 = vpop.f32.mrb[8].mxu0 }
 0x118   : > { %v581_v43 = vpop.f32.mrb[9].mxu0 }
 0x119   : > { %v447_v44 = vmax.f32 %v421_v41, 0.0  ;;  %v582_v45 = vadd.f32 %v581_v43, %v580_v42 }
 0x11b   : > { %456 = vst.msk [vmem:[%s838_s14 + $0x18] sm:$0xff] %vm452_vm2, %v447_v44  ;;  %v426_v46 = vadd.f32 %v582_v45, %v425_v20  ;;  %v583_v47 = vpop.f32.mrb[10].mxu0 }
 0x11c   : > { %v584_v48 = vpop.f32.mrb[11].mxu0 }
 0x11d   : > { %v448_v49 = vmax.f32 %v426_v46, 0.0  ;;  %v585_v50 = vadd.f32 %v584_v48, %v583_v47 }
 0x11f   : > { %457 = vst.msk [vmem:[%s838_s14 + $0x20] sm:$0xff] %vm452_vm2, %v448_v49  ;;  %v431_v51 = vadd.f32 %v623_v19, %v585_v50  ;;  %v586_v52 = vpop.f32.mrb[12].mxu0 }
 0x120   : > { %v587_v53 = vpop.f32.mrb[13].mxu0 }
 0x121   : > { %v449_v54 = vmax.f32 %v431_v51, 0.0  ;;  %v588_v55 = vadd.f32 %v587_v53, %v586_v52 }
 0x123   : > { %458 = vst.msk [vmem:[%s838_s14 + $0x28] sm:$0xff] %vm452_vm2, %v449_v54  ;;  %v436_v56 = vadd.f32 %v588_v55, %v435_v23  ;;  %v589_v57 = vpop.f32.mrb[14].mxu0 }
 0x124   : > { %v590_v58 = vpop.f32.mrb[15].mxu0 }
 0x125   : > { %v450_v59 = vmax.f32 %v436_v56, 0.0  ;;  %v591_v60 = vadd.f32 %v590_v58, %v589_v57 }
 0x127   : > { %459 = vst.msk [vmem:[%s838_s14 + $0x30] sm:$0xff] %vm452_vm2, %v450_v59  ;;  %v441_v61 = vadd.f32 %v626_v21, %v591_v60 }
 0x129   : > { %v451_v62 = vmax.f32 %v441_v61, 0.0 }
 0x12b   : > { %460 = vst.msk [vmem:[%s838_s14 + $0x38] sm:$0xff] %vm452_vm2, %v451_v62 }
 0x12c PF: > { %s12_s9 = sadd.s32 1, %s682_s9  }
 0x12d   : > { %p9_p4 = scmp.ge.s32.totalorder %s12_s9, 4  }
 0x12f   :  { %11 = sbr.rel (!%p9_p4) target bundleno = 1 (0x1), region = 58 }

// kernel: generator_forward.8
= control target key start
LH: loop header
LB: loop body
LE: loop exit
PB: predicated region body
PF: predicated region fallthrough
CT: control target
= control target key end

     0   :  { %s436_s9 = smov 0   ;;  %s524_s0 = inlined_call_operand.vmem [shape: f32[2,145,64], index: 0, kind: input, shape index: {}]   ;;  %s525_s1 = inlined_call_operand.vmem [shape: f32[32,145], index: 1, kind: input, shape index: {}]   ;;  %s526_s2 = inlined_call_operand.vmem [shape: f32[2,32,64], index: 2, kind: output, shape index: {}]  }
   0x1 LB: > { %s337_s10 = sadd.s32 4294967295, %s417_s9   ;;  %p341_p0 = scmp.ge.s32.totalorder %s417_s9, 1  ;;  %s417_s9 = sphi %s436_s9, %s12_s9  }
   0x2   : > { %p112_p1 = scmp.lt.s32.totalorder %s417_s9, 3 }
   0x4   : > { %p113_p2 = pnand %p341_p0, %p112_p1 }
   0x5   : > { %p134_p3 = scmp.lt.s32.totalorder (!%p113_p2), %s337_s10, 1  ;;  %v145_v0 = vld [vmem:[%s525_s1 + $0x8] sm:$0xff] (!%p113_p2)  ;;  %vm171_vm0 = vcmask (!%p113_p2), 138240   ;;  %v419_v1 = vmov (!%p113_p2), 0.0|0.0   ;;  %v420_v30 = vmov (!%p113_p2), 0.0   ;;  %vm184_vm1 = vcmask (!%p113_p2), 1040384  }
   0x6   : > { %116 = sbr.rel (%p113_p2) target bundleno = 276 (0x114), region = 28  ;;  %353 = vmatprep.subr.bf16.mxu0 (!%p113_p2), %v419_v1  ;;  %380 = vmatprep.subr.bf16.mxu1 (!%p113_p2), %v419_v1  ;;  %v149_v2 = vld [vmem:[%s525_s1 + $0x28] sm:$0xff] (!%p113_p2)  ;;  %v144_v32 = vld [vmem:[%s525_s1] sm:$0xff] (!%p113_p2)  ;;  %v147_v34 = vld [vmem:[%s525_s1 + $0x18] sm:$0xff] (!%p113_p2)  ;;  %vm277_vm2 = vcmask (!%p113_p2), 523264  }
   0x7   : > { %346 = vmatprep.mubr.msk.f32.mxu0 (!%p113_p2), %vm171_vm0, %v145_v0  ;;  %348 = vmatprep.mubr.msk.f32.mxu1 (!%p113_p2), %vm171_vm0, %v149_v2  ;;  %v148_v33 = vld [vmem:[%s525_s1 + $0x20] sm:$0xff] (!%p113_p2)  ;;  %v151_v35 = vld [vmem:[%s525_s1 + $0x38] sm:$0xff] (!%p113_p2)  ;;  %v146_v36 = vld [vmem:[%s525_s1 + $0x10] sm:$0xff] (!%p113_p2) }
   0x8   : > { %v150_v37 = vld [vmem:[%s525_s1 + $0x30] sm:$0xff] (!%p113_p2) }
   0xd   : > { %s528_s10 = smov (!%p134_p3, %s337_s10), 1 }
   0xe   : > { %s400_s15 = smul.u32 152, %s528_s10  ;;  %s352_s3 = sshll.u32 %s528_s10, 5 }
   0xf   : > { %s143_s6 = scalar_lea.vmem %s526_s2, %s352_s3 }
  0x10   : > { %s460_s18 = scalar_lea.vmem %s524_s0, %s400_s15 }
  0x11   : > { %v152_v3 = vld [vmem:[%s460_s18] sm:$0xff]  ;;  %v153_v4 = vld [vmem:[%s460_s18 + $0x8] sm:$0xff]  ;;  %v154_v5 = vld [vmem:[%s460_s18 + $0x10] sm:$0xff] }
  0x12   : > { %v354_v6 = vpack.c.bf16 %v153_v4, %v152_v3  ;;  %v155_v7 = vld [vmem:[%s460_s18 + $0x18] sm:$0xff]  ;;  %v156_v9 = vld [vmem:[%s460_s18 + $0x20] sm:$0xff]  ;;  %v157_v10 = vld [vmem:[%s460_s18 + $0x28] sm:$0xff] }
  0x13   : > { %v357_v8 = vpack.c.bf16 %v155_v7, %v154_v5  ;;  %v360_v11 = vpack.c.bf16 %v157_v10, %v156_v9  ;;  %v158_v12 = vld [vmem:[%s460_s18 + $0x30] sm:$0xff]  ;;  %v159_v13 = vld [vmem:[%s460_s18 + $0x38] sm:$0xff]  ;;  %v160_v15 = vld [vmem:[%s460_s18 + $0x40] sm:$0xff] }
  0x14   : > { %355 = vmatpush1.bf16.msra.mxu0 %v354_v6  ;;  %390 = vmatpush1.bf16.msra.mxu1 %v354_v6  ;;  %v363_v14 = vpack.c.bf16 %v159_v13, %v158_v12  ;;  %v161_v16 = vld [vmem:[%s460_s18 + $0x48] sm:$0xff]  ;;  %v162_v18 = vld [vmem:[%s460_s18 + $0x50] sm:$0xff]  ;;  %v163_v19 = vld [vmem:[%s460_s18 + $0x58] sm:$0xff] }
  0x15   : > { %356 = vmatprep.subr.bf16.mxu0 %v419_v1  ;;  %381 = vmatprep.subr.bf16.mxu1 %v419_v1  ;;  %v366_v17 = vpack.c.bf16 %v161_v16, %v160_v15  ;;  %v369_v20 = vpack.c.bf16 %v163_v19, %v162_v18  ;;  %v164_v21 = vld [vmem:[%s460_s18 + $0x60] sm:$0xff]  ;;  %v165_v22 = vld [vmem:[%s460_s18 + $0x68] sm:$0xff]  ;;  %v166_v24 = vld [vmem:[%s460_s18 + $0x70] sm:$0xff] }
  0x16   : > { %v372_v23 = vpack.c.bf16 %v165_v22, %v164_v21  ;;  %v167_v25 = vld [vmem:[%s460_s18 + $0x78] sm:$0xff]  ;;  %v168_v27 = vld [vmem:[%s460_s18 + $0x80] sm:$0xff]  ;;  %v169_v28 = vld [vmem:[%s460_s18 + $0x88] sm:$0xff] }
  0x17   : > { %v375_v26 = vpack.c.bf16 %v167_v25, %v166_v24  ;;  %v378_v29 = vpack.c.bf16 %v169_v28, %v168_v27  ;;  %v170_v31 = vld [vmem:[%s460_s18 + $0x90] sm:$0x1] }
  0x18   : > { %358 = vmatpush1.bf16.msra.mxu0 %v357_v8  ;;  %391 = vmatpush1.bf16.msra.mxu1 %v357_v8 }
  0x19   : > { %359 = vmatprep.subr.bf16.mxu0 %v419_v1  ;;  %382 = vmatprep.subr.bf16.mxu1 %v419_v1 }
  0x1c   : > { %361 = vmatpush1.bf16.msra.mxu0 %v360_v11  ;;  %392 = vmatpush1.bf16.msra.mxu1 %v360_v11 }
  0x1d   : > { %362 = vmatprep.subr.bf16.mxu0 %v419_v1  ;;  %383 = vmatprep.subr.bf16.mxu1 %v419_v1 }
  0x20   : > { %364 = vmatpush1.bf16.msra.mxu0 %v363_v14  ;;  %393 = vmatpush1.bf16.msra.mxu1 %v363_v14 }
  0x21   : > { %365 = vmatprep.subr.bf16.mxu0 %v419_v1  ;;  %384 = vmatprep.subr.bf16.mxu1 %v419_v1 }
  0x24   : > { %367 = vmatpush1.bf16.msra.mxu0 %v366_v17  ;;  %394 = vmatpush1.bf16.msra.mxu1 %v366_v17 }
  0x25   : > { %368 = vmatprep.subr.bf16.mxu0 %v419_v1  ;;  %385 = vmatprep.subr.bf16.mxu1 %v419_v1 }
  0x28   : > { %370 = vmatpush1.bf16.msra.mxu0 %v369_v20  ;;  %395 = vmatpush1.bf16.msra.mxu1 %v369_v20 }
  0x29   : > { %371 = vmatprep.subr.bf16.mxu0 %v419_v1  ;;  %386 = vmatprep.subr.bf16.mxu1 %v419_v1 }
  0x2c   : > { %373 = vmatpush1.bf16.msra.mxu0 %v372_v23  ;;  %396 = vmatpush1.bf16.msra.mxu1 %v372_v23 }
  0x2d   : > { %374 = vmatprep.subr.bf16.mxu0 %v419_v1  ;;  %387 = vmatprep.subr.bf16.mxu1 %v419_v1 }
  0x30   : > { %376 = vmatpush1.bf16.msra.mxu0 %v375_v26  ;;  %397 = vmatpush1.bf16.msra.mxu1 %v375_v26 }
  0x31   : > { %377 = vmatprep.subr.bf16.mxu0 %v419_v1  ;;  %388 = vmatprep.subr.bf16.mxu1 %v419_v1 }
  0x34   : > { %379 = vmatpush1.bf16.msra.mxu0 %v378_v29  ;;  %398 = vmatpush1.bf16.msra.mxu1 %v378_v29 }
  0x35   : > { %224 = vmatprep.subr.mxu0 %v420_v30  ;;  %389 = vmatprep.subr.mxu1 %v420_v30 }
  0x38   : > { %345 = vmatpush1.msk.msra.mxu0 %vm184_vm1, %v170_v31  ;;  %399 = vmatpush1.msk.msra.mxu1 %vm184_vm1, %v170_v31 }
  0x39   : > { %253 = vmatmul.mubr.f32.vlgmr.msra.gmra.mrb[0].mxu0 %v144_v32  ;;  %263 = vmatmul.mubr.f32.vlgmr.msra.gmra.mrb[0].mxu1 %v148_v33 }
  0x3a   : > { %347 = vmatprep.mubr.msk.f32.mxu0 %vm171_vm0, %v147_v34  ;;  %349 = vmatprep.mubr.msk.f32.mxu1 %vm171_vm0, %v151_v35 }
  0x3d   : > { %258 = vmatmul.mubr.f32.gmra.mrb[2].mxu0 %v146_v36  ;;  %268 = vmatmul.mubr.f32.gmra.mrb[2].mxu1 %v150_v37 }
 0x10c   : > { %v254_v38 = vpop.f32.mrb[0].mxu0  ;;  %v264_v39 = vpop.f32.mrb[0].mxu1 }
 0x10d   : > { %v273_v40 = vmax.f32 %v254_v38, 0.0  ;;  %v275_v41 = vmax.f32 %v264_v39, 0.0  ;;  %v256_v42 = vpop.f32.mrb[1].mxu0  ;;  %v266_v43 = vpop.f32.mrb[1].mxu1 }
 0x10f   : > { %278 = vst.msk [vmem:[%s143_s6] sm:$0xff] %vm277_vm2, %v273_v40  ;;  %280 = vst.msk [vmem:[%s143_s6 + $0x10] sm:$0xff] %vm277_vm2, %v275_v41 }
 0x110   : > { %v259_v44 = vpop.f32.mrb[2].mxu0  ;;  %v269_v45 = vpop.f32.mrb[2].mxu1 }
 0x111   : > { %v274_v46 = vmax.f32 %v259_v44, 0.0  ;;  %v276_v47 = vmax.f32 %v269_v45, 0.0  ;;  %v261_v48 = vpop.f32.mrb[3].mxu0  ;;  %v271_v49 = vpop.f32.mrb[3].mxu1 }
 0x113   : > { %279 = vst.msk [vmem:[%s143_s6 + $0x8] sm:$0xff] %vm277_vm2, %v274_v46  ;;  %281 = vst.msk [vmem:[%s143_s6 + $0x18] sm:$0xff] %vm277_vm2, %v276_v47 }
 0x114 PF: > { %s12_s9 = sadd.s32 1, %s417_s9  }
 0x115   : > { %p9_p4 = scmp.ge.s32.totalorder %s12_s9, 4  }
 0x117   :  { %11 = sbr.rel (!%p9_p4) target bundleno = 1 (0x1), region = 58 }

// kernel: generator_forward.9
= control target key start
LH: loop header
LB: loop body
LE: loop exit
PB: predicated region body
PF: predicated region fallthrough
CT: control target
= control target key end

     0   :  { %s403_s9 = smov 0   ;;  %s452_s0 = inlined_call_operand.vmem [shape: f32[2,73,256], index: 0, kind: input, shape index: {}]   ;;  %s453_s1 = inlined_call_operand.vmem [shape: f32[16,73], index: 1, kind: input, shape index: {}]   ;;  %s454_s2 = inlined_call_operand.vmem [shape: f32[2,16,256], index: 2, kind: output, shape index: {}]  }
   0x1 LB: > { %s320_s10 = sadd.s32 4294967295, %s384_s9   ;;  %p324_p0 = scmp.ge.s32.totalorder %s384_s9, 1  ;;  %s384_s9 = sphi %s403_s9, %s12_s9  }
   0x2   : > { %p112_p1 = scmp.lt.s32.totalorder %s384_s9, 3 }
   0x4   : > { %p113_p2 = pnand %p324_p0, %p112_p1 }
   0x5   : > { %p134_p3 = scmp.lt.s32.totalorder (!%p113_p2), %s320_s10, 1  ;;  %v386_v0 = vmov (!%p113_p2), 0.0   ;;  %vm173_vm0 = vcmask (!%p113_p2), 1040384   ;;  %vm387_vm1 = vmmov (!%p113_p2), 1   ;;  %v144_v31 = vld [vmem:[%s453_s1] sm:$0xff] (!%p113_p2)  ;;  %vm166_vm3 = vcmask (!%p113_p2), 596992  }
   0x6   : > { %116 = sbr.rel (%p113_p2) target bundleno = 256 (0x100), region = 28  ;;  %244 = vmatprep.mubr.f32.mxu0 (!%p113_p2), %v386_v0  ;;  %250 = vmatprep.mubr.f32.mxu1 (!%p113_p2), %v386_v0  ;;  %vm352_vm2 = vmpackc.low (!%p113_p2), %vm173_vm0, %vm387_vm1  ;;  %v145_v32 = vld [vmem:[%s453_s1 + $0x8] sm:$0xff] (!%p113_p2) }
   0xd   : > { %s456_s10 = smov (!%p134_p3, %s320_s10), 1 }
   0xe   : > { %s367_s11 = smul.u32 160, %s456_s10  ;;  %s334_s19 = sshll.u32 %s456_s10, 5 }
   0xf   : > { %s143_s22 = scalar_lea.vmem %s454_s2, %s334_s19 }
  0x10   : > { %s417_s14 = scalar_lea.vmem %s452_s0, %s367_s11 }
  0x11   : > { %v147_v1 = vld [vmem:[%s417_s14 + $0x8] sm:$0xff]  ;;  %v149_v2 = vld [vmem:[%s417_s14 + $0x18] sm:$0xff]  ;;  %v146_v3 = vld [vmem:[%s417_s14] sm:$0xff] }
  0x12   : > { %v335_v4 = vpack.c.bf16 %v149_v2, %v147_v1  ;;  %v148_v5 = vld [vmem:[%s417_s14 + $0x10] sm:$0xff]  ;;  %v151_v6 = vld [vmem:[%s417_s14 + $0x28] sm:$0xff]  ;;  %v153_v7 = vld [vmem:[%s417_s14 + $0x38] sm:$0xff] }
  0x13   : > { %v337_v8 = vpack.c.bf16 %v148_v5, %v146_v3  ;;  %v339_v9 = vpack.c.bf16 %v153_v7, %v151_v6  ;;  %v150_v10 = vld [vmem:[%s417_s14 + $0x20] sm:$0xff]  ;;  %v152_v11 = vld [vmem:[%s417_s14 + $0x30] sm:$0xff]  ;;  %v155_v12 = vld [vmem:[%s417_s14 + $0x48] sm:$0xff] }
  0x14   : > { %336 = vmatprep.subr.bf16.mxu0 %v335_v4  ;;  %357 = vmatprep.subr.bf16.mxu1 %v335_v4  ;;  %v157_v13 = vld [vmem:[%s417_s14 + $0x58] sm:$0xff]  ;;  %v341_v14 = vpack.c.bf16 %v152_v11, %v150_v10  ;;  %v154_v16 = vld [vmem:[%s417_s14 + $0x40] sm:$0xff]  ;;  %v156_v17 = vld [vmem:[%s417_s14 + $0x50] sm:$0xff] }
  0x15   : > { %338 = vmatpush1.bf16.msra.mxu0 %v337_v8  ;;  %362 = vmatpush1.bf16.msra.mxu1 %v337_v8  ;;  %v343_v15 = vpack.c.bf16 %v157_v13, %v155_v12  ;;  %v159_v18 = vld [vmem:[%s417_s14 + $0x68] sm:$0xff]  ;;  %v161_v19 = vld [vmem:[%s417_s14 + $0x78] sm:$0xff]  ;;  %v345_v20 = vpack.c.bf16 %v156_v17, %v154_v16  ;;  %v158_v22 = vld [vmem:[%s417_s14 + $0x60] sm:$0xff] }
  0x16   : > { %340 = vmatprep.subr.bf16.mxu0 %v339_v9  ;;  %358 = vmatprep.subr.bf16.mxu1 %v339_v9  ;;  %v347_v21 = vpack.c.bf16 %v161_v19, %v159_v18  ;;  %v160_v23 = vld [vmem:[%s417_s14 + $0x70] sm:$0xff]  ;;  %v163_v24 = vld [vmem:[%s417_s14 + $0x88] sm:$0xff]  ;;  %v165_v25 = vld [vmem:[%s417_s14 + $0x98] sm:$0x1] }
  0x17   : > { %v349_v26 = vpack.c.bf16 %v160_v23, %v158_v22  ;;  %v351_v27 = vpack.c.bf16 %v165_v25, %v163_v24  ;;  %v162_v28 = vld [vmem:[%s417_s14 + $0x80] sm:$0xff]  ;;  %v164_v29 = vld [vmem:[%s417_s14 + $0x90] sm:$0x1] }
  0x18   : > { %v354_v30 = vpack.c.bf16 %v164_v29, %v162_v28 }
  0x19   : > { %342 = vmatpush1.bf16.msra.mxu0 %v341_v14  ;;  %363 = vmatpush1.bf16.msra.mxu1 %v341_v14 }
  0x1a   : > { %344 = vmatprep.subr.bf16.mxu0 %v343_v15  ;;  %359 = vmatprep.subr.bf16.mxu1 %v343_v15 }
  0x1d   : > { %346 = vmatpush1.bf16.msra.mxu0 %v345_v20  ;;  %364 = vmatpush1.bf16.msra.mxu1 %v345_v20 }
  0x1e   : > { %348 = vmatprep.subr.bf16.mxu0 %v347_v21  ;;  %360 = vmatprep.subr.bf16.mxu1 %v347_v21 }
  0x21   : > { %350 = vmatpush1.bf16.msra.mxu0 %v349_v26  ;;  %365 = vmatpush1.bf16.msra.mxu1 %v349_v26 }
  0x22   : > { %353 = vmatprep.subr.msk.bf16.mxu0 %vm352_vm2, %v351_v27  ;;  %361 = vmatprep.subr.msk.bf16.mxu1 %vm352_vm2, %v351_v27 }
  0x25   : > { %356 = vmatpush1.bf16.msk.msra.mxu0 %vm352_vm2, %v354_v30  ;;  %366 = vmatpush1.bf16.msk.msra.mxu1 %vm352_vm2, %v354_v30 }
  0x28   : > { %330 = vmatmul.mubr.msk.f32.vlgmr.msra.gmra.mrb[0].mxu0 %vm166_vm3, %v144_v31  ;;  %331 = vmatmul.mubr.msk.f32.vlgmr.msra.gmra.mrb[0].mxu1 %vm166_vm3, %v145_v32 }
  0xfb   : > { %v246_v33 = vpop.f32.mrb[0].mxu0  ;;  %v252_v34 = vpop.f32.mrb[0].mxu1 }
  0xfc   : > { %v257_v35 = vmax.f32 %v246_v33, 0.0  ;;  %v259_v36 = vmax.f32 %v252_v34, 0.0  ;;  %v248_v37 = vpop.f32.mrb[1].mxu0  ;;  %v254_v38 = vpop.f32.mrb[1].mxu1 }
  0xfd   : > { %v258_v39 = vmax.f32 %v248_v37, 0.0  ;;  %v260_v40 = vmax.f32 %v254_v38, 0.0 }
  0xfe   : > { %261 = vst [vmem:[%s143_s22] sm:$0xff] %v257_v35  ;;  %263 = vst [vmem:[%s143_s22 + $0x10] sm:$0xff] %v259_v36 }
  0xff   : > { %262 = vst [vmem:[%s143_s22 + $0x8] sm:$0xff] %v258_v39  ;;  %264 = vst [vmem:[%s143_s22 + $0x18] sm:$0xff] %v260_v40 }
 0x100 PF: > { %s12_s9 = sadd.s32 1, %s384_s9  }
 0x101   : > { %p9_p4 = scmp.ge.s32.totalorder %s12_s9, 4  }
 0x103   :  { %11 = sbr.rel (!%p9_p4) target bundleno = 1 (0x1), region = 58 }

// kernel: generator_forward.10
= control target key start
LH: loop header
LB: loop body
LE: loop exit
PB: predicated region body
PF: predicated region fallthrough
CT: control target
= control target key end

     0   :  { %s658_s9 = smov 0   ;;  %s740_s0 = inlined_call_operand.vmem [shape: f32[2,37,1024], index: 0, kind: input, shape index: {}]   ;;  %s741_s1 = inlined_call_operand.vmem [shape: f32[8,37], index: 1, kind: input, shape index: {}]   ;;  %s742_s2 = inlined_call_operand.vmem [shape: f32[2,8,1024], index: 2, kind: output, shape index: {}]  }
   0x1 LB: > { %s569_s10 = sadd.s32 4294967295, %s640_s9   ;;  %p573_p0 = scmp.ge.s32.totalorder %s640_s9, 1  ;;  %s640_s9 = sphi %s658_s9, %s12_s9  }
   0x2   : > { %p112_p1 = scmp.lt.s32.totalorder %s640_s9, 3 }
   0x4   : > { %p113_p2 = pnand %p573_p0, %p112_p1 }
   0x5   : > { %p134_p3 = scmp.lt.s32.totalorder (!%p113_p2), %s569_s10, 1  ;;  %v642_v0 = vmov (!%p113_p2), 0.0   ;;  %vm189_vm0 = vcmask (!%p113_p2), 1044480   ;;  %v144_v32 = vld [vmem:[%s741_s1] sm:$0xff] (!%p113_p2)  ;;  %vm185_vm1 = vcmask (!%p113_p2), 302080  }
   0x6   : > { %116 = sbr.rel (%p113_p2) target bundleno = 259 (0x103), region = 28  ;;  %278 = vmatprep.mubr.f32.mxu0 (!%p113_p2), %v642_v0  ;;  %349 = vmatprep.mubr.f32.mxu1 (!%p113_p2), %v642_v0 }
   0xd   : > { %s744_s10 = smov (!%p134_p3, %s569_s10), 1 }
   0xe   : > { %s624_s11 = smul.u32 320, %s744_s10  ;;  %s591_s17 = sshll.u32 %s744_s10, 6 }
   0xf   : > { %s143_s20 = scalar_lea.vmem %s742_s2, %s591_s17 }
  0x10   : > { %s674_s14 = scalar_lea.vmem %s740_s0, %s624_s11 }
  0x11   : > { %v146_v1 = vld [vmem:[%s674_s14 + $0x8] sm:$0xff]  ;;  %v148_v3 = vld [vmem:[%s674_s14 + $0x18] sm:$0xff]  ;;  %v145_v6 = vld [vmem:[%s674_s14] sm:$0xff] }
  0x12   : > { %v154_v2 = vld [vmem:[%s674_s14 + $0x48] sm:$0xff]  ;;  %v156_v5 = vld [vmem:[%s674_s14 + $0x58] sm:$0xff]  ;;  %v153_v7 = vld [vmem:[%s674_s14 + $0x40] sm:$0xff] }
  0x13   : > { %v592_v4 = vpack.c.bf16 %v154_v2, %v146_v1  ;;  %v600_v8 = vpack.c.bf16 %v156_v5, %v148_v3  ;;  %v594_v9 = vpack.c.bf16 %v153_v7, %v145_v6  ;;  %v147_v10 = vld [vmem:[%s674_s14 + $0x10] sm:$0xff]  ;;  %v162_v12 = vld [vmem:[%s674_s14 + $0x88] sm:$0xff]  ;;  %v164_v15 = vld [vmem:[%s674_s14 + $0x98] sm:$0xff] }
  0x14   : > { %v155_v11 = vld [vmem:[%s674_s14 + $0x50] sm:$0xff]  ;;  %v170_v14 = vld [vmem:[%s674_s14 + $0xc8] sm:$0xff]  ;;  %v172_v16 = vld [vmem:[%s674_s14 + $0xd8] sm:$0xff] }
  0x15   : > { %593 = vmatprep.subr.bf16.mxu0 %v592_v4  ;;  %v602_v13 = vpack.c.bf16 %v155_v11, %v147_v10  ;;  %601 = vmatprep.subr.bf16.mxu1 %v600_v8  ;;  %v596_v17 = vpack.c.bf16 %v170_v14, %v162_v12  ;;  %v604_v18 = vpack.c.bf16 %v172_v16, %v164_v15  ;;  %v161_v19 = vld [vmem:[%s674_s14 + $0x80] sm:$0xff]  ;;  %v163_v21 = vld [vmem:[%s674_s14 + $0x90] sm:$0xff]  ;;  %v178_v25 = vld [vmem:[%s674_s14 + $0x108] sm:$0x1f] }
  0x16   : > { %595 = vmatpush1.bf16.msra.mxu0 %v594_v9  ;;  %v169_v20 = vld [vmem:[%s674_s14 + $0xc0] sm:$0xff]  ;;  %v171_v23 = vld [vmem:[%s674_s14 + $0xd0] sm:$0xff]  ;;  %v180_v26 = vld [vmem:[%s674_s14 + $0x118] sm:$0x1f] }
  0x17   : > { %603 = vmatpush1.bf16.msra.mxu1 %v602_v13  ;;  %v598_v22 = vpack.c.bf16 %v169_v20, %v161_v19  ;;  %597 = vmatprep.subr.bf16.mxu0 %v596_v17  ;;  %v606_v24 = vpack.c.bf16 %v171_v23, %v163_v21  ;;  %v150_v27 = vld [vmem:[%s674_s14 + $0x28] sm:$0xff]  ;;  %v177_v28 = vld [vmem:[%s674_s14 + $0x100] sm:$0x1f]  ;;  %v152_v30 = vld [vmem:[%s674_s14 + $0x38] sm:$0xff] }
  0x18   : > { %605 = vmatprep.subr.bf16.mxu1 %v604_v18  ;;  %v158_v29 = vld [vmem:[%s674_s14 + $0x68] sm:$0xff]  ;;  %v160_v31 = vld [vmem:[%s674_s14 + $0x78] sm:$0xff]  ;;  %v149_v33 = vld [vmem:[%s674_s14 + $0x20] sm:$0xff] }
  0x19   : > { %v157_v34 = vld [vmem:[%s674_s14 + $0x60] sm:$0xff]  ;;  %v151_v35 = vld [vmem:[%s674_s14 + $0x30] sm:$0xff]  ;;  %v166_v37 = vld [vmem:[%s674_s14 + $0xa8] sm:$0xff]  ;;  %v608_v40 = vpack.c.bf16 %v158_v29, %v150_v27  ;;  %v616_v43 = vpack.c.bf16 %v160_v31, %v152_v30 }
  0x1a   : > { %599 = vmatpush1.bf16.msra.mxu0 %v598_v22  ;;  %v159_v36 = vld [vmem:[%s674_s14 + $0x70] sm:$0xff]  ;;  %v174_v38 = vld [vmem:[%s674_s14 + $0xe8] sm:$0xff]  ;;  %v168_v41 = vld [vmem:[%s674_s14 + $0xb8] sm:$0xff]  ;;  %v610_v44 = vpack.c.bf16 %v157_v34, %v149_v33 }
  0x1b   : > { %607 = vmatpush1.bf16.msra.mxu1 %v606_v24  ;;  %577 = vmatprep.subr.msk.mxu0 %vm189_vm0, %v178_v25  ;;  %v179_v39 = vld [vmem:[%s674_s14 + $0x110] sm:$0x1f]  ;;  %v176_v42 = vld [vmem:[%s674_s14 + $0xf8] sm:$0xff]  ;;  %v618_v45 = vpack.c.bf16 %v159_v36, %v151_v35  ;;  %v612_v46 = vpack.c.bf16 %v174_v38, %v166_v37  ;;  %v165_v47 = vld [vmem:[%s674_s14 + $0xa0] sm:$0xff] }
  0x1c   : > { %580 = vmatprep.subr.msk.mxu1 %vm189_vm0, %v180_v26  ;;  %v173_v48 = vld [vmem:[%s674_s14 + $0xe0] sm:$0xff]  ;;  %v620_v49 = vpack.c.bf16 %v176_v42, %v168_v41  ;;  %v167_v50 = vld [vmem:[%s674_s14 + $0xb0] sm:$0xff]  ;;  %v182_v54 = vld [vmem:[%s674_s14 + $0x128] sm:$0x1f] }
  0x1d   : > { %v175_v51 = vld [vmem:[%s674_s14 + $0xf0] sm:$0xff]  ;;  %v614_v52 = vpack.c.bf16 %v173_v48, %v165_v47  ;;  %v184_v55 = vld [vmem:[%s674_s14 + $0x138] sm:$0x1f]  ;;  %v181_v56 = vld [vmem:[%s674_s14 + $0x120] sm:$0x1f] }
  0x1e   : > { %578 = vmatpush1.msk.msra.mxu0 %vm189_vm0, %v177_v28  ;;  %v622_v53 = vpack.c.bf16 %v175_v51, %v167_v50  ;;  %v183_v57 = vld [vmem:[%s674_s14 + $0x130] sm:$0x1f] }
  0x1f   : > { %581 = vmatpush1.msk.msra.mxu1 %vm189_vm0, %v179_v39  ;;  %579 = vmatmul.mubr.msk.f32.vlgmr.msra.gmra.mrb[0].mxu0 %vm185_vm1, %v144_v32 }
  0x20   : > { %582 = vmatmul.mubr.msk.f32.vlgmr.msra.gmra.mrb[0].mxu1 %vm185_vm1, %v144_v32  ;;  %609 = vmatprep.subr.bf16.mxu0 %v608_v40 }
  0x21   : > { %617 = vmatprep.subr.bf16.mxu1 %v616_v43  ;;  %611 = vmatpush1.bf16.msra.mxu0 %v610_v44 }
  0x22   : > { %619 = vmatpush1.bf16.msra.mxu1 %v618_v45  ;;  %613 = vmatprep.subr.bf16.mxu0 %v612_v46 }
  0x23   : > { %621 = vmatprep.subr.bf16.mxu1 %v620_v49  ;;  %420 = vmatprep.mubr.f32.mxu0 %v642_v0 }
  0x24   : > { %491 = vmatprep.mubr.f32.mxu1 %v642_v0 }
  0x25   : > { %615 = vmatpush1.bf16.msra.mxu0 %v614_v52 }
  0x26   : > { %623 = vmatpush1.bf16.msra.mxu1 %v622_v53  ;;  %583 = vmatprep.subr.msk.mxu0 %vm189_vm0, %v182_v54 }
  0x27   : > { %586 = vmatprep.subr.msk.mxu1 %vm189_vm0, %v184_v55 }
  0x29   : > { %584 = vmatpush1.msk.msra.mxu0 %vm189_vm0, %v181_v56 }
  0x2a   : > { %587 = vmatpush1.msk.msra.mxu1 %vm189_vm0, %v183_v57  ;;  %585 = vmatmul.mubr.msk.f32.vlgmr.msra.gmra.mrb[2].mxu0 %vm185_vm1, %v144_v32 }
  0x2b   : > { %588 = vmatmul.mubr.msk.f32.vlgmr.msra.gmra.mrb[2].mxu1 %vm185_vm1, %v144_v32 }
  0xf2   : > { %v280_v58 = vpop.f32.mrb[0].mxu0 }
  0xf3   : > { %v498_v59 = vmax.f32 %v280_v58, 0.0  ;;  %v351_v60 = vpop.f32.mrb[0].mxu1  ;;  %v282_v61 = vpop.f32.mrb[1].mxu0 }
  0xf4   : > { %v500_v62 = vmax.f32 %v351_v60, 0.0  ;;  %v499_v63 = vmax.f32 %v282_v61, 0.0  ;;  %v353_v0 = vpop.f32.mrb[1].mxu1 }
  0xf5   : > { %506 = vst [vmem:[%s143_s20] sm:$0xff] %v498_v59  ;;  %v501_v1 = vmax.f32 %v353_v0, 0.0 }
  0xf6   : > { %508 = vst [vmem:[%s143_s20 + $0x10] sm:$0xff] %v500_v62  ;;  %507 = vst [vmem:[%s143_s20 + $0x8] sm:$0xff] %v499_v63 }
  0xf7   : > { %509 = vst [vmem:[%s143_s20 + $0x18] sm:$0xff] %v501_v1 }
  0xfd   : > { %v422_v2 = vpop.f32.mrb[2].mxu0 }
  0xfe   : > { %v502_v3 = vmax.f32 %v422_v2, 0.0  ;;  %v493_v4 = vpop.f32.mrb[2].mxu1  ;;  %v424_v5 = vpop.f32.mrb[3].mxu0 }
  0xff   : > { %v504_v6 = vmax.f32 %v493_v4, 0.0  ;;  %v503_v7 = vmax.f32 %v424_v5, 0.0  ;;  %v495_v8 = vpop.f32.mrb[3].mxu1 }
 0x100   : > { %510 = vst [vmem:[%s143_s20 + $0x20] sm:$0xff] %v502_v3  ;;  %v505_v9 = vmax.f32 %v495_v8, 0.0 }
 0x101   : > { %512 = vst [vmem:[%s143_s20 + $0x30] sm:$0xff] %v504_v6  ;;  %511 = vst [vmem:[%s143_s20 + $0x28] sm:$0xff] %v503_v7 }
 0x102   : > { %513 = vst [vmem:[%s143_s20 + $0x38] sm:$0xff] %v505_v9 }
 0x103 PF: > { %s12_s9 = sadd.s32 1, %s640_s9  }
 0x104   : > { %p9_p4 = scmp.ge.s32.totalorder %s12_s9, 4  }
 0x106   :  { %11 = sbr.rel (!%p9_p4) target bundleno = 1 (0x1), region = 58 }

// kernel: generator_forward.11
= control target key start
LH: loop header
LB: loop body
LE: loop exit
PB: predicated region body
PF: predicated region fallthrough
CT: control target
= control target key end

     0   :  { %s2090_s9 = smov 0   ;;  %s2312_s0 = inlined_call_operand.vmem [shape: f32[2,19,4096], index: 0, kind: input, shape index: {}]   ;;  %s2313_s1 = inlined_call_operand.vmem [shape: f32[3,19], index: 1, kind: input, shape index: {}]   ;;  %s2314_s2 = inlined_call_operand.vmem [shape: f32[2,3,4096], index: 2, kind: output, shape index: {}]  }
   0x1 LB: > { %s1805_s10 = sadd.s32 4294967295, %s2072_s9   ;;  %p1809_p0 = scmp.ge.s32.totalorder %s2072_s9, 1  ;;  %s2072_s9 = sphi %s2090_s9, %s12_s9  }
   0x2   : > { %p112_p1 = scmp.lt.s32.totalorder %s2072_s9, 3 }
   0x4   : > { %p113_p2 = pnand %p1809_p0, %p112_p1 }
   0x5   : > { %p134_p3 = scmp.lt.s32.totalorder (!%p113_p2), %s1805_s10, 1  ;;  %v2074_v0 = vmov (!%p113_p2), 0.0   ;;  %vm245_vm0 = vcmask (!%p113_p2), 1042432   ;;  %v2122_v16 = vld [vmem:[%s2313_s1] sm:$0x7] (!%p113_p2)  ;;  %vm241_vm1 = vcmask (!%p113_p2), 154624  }
   0x6   : > { %116 = sbr.rel (%p113_p2) target bundleno = 330 (0x14a), region = 28  ;;  %406 = vmatprep.mubr.f32.mxu0 (!%p113_p2), %v2074_v0  ;;  %477 = vmatprep.mubr.f32.mxu1 (!%p113_p2), %v2074_v0 }
   0xd   : > { %s2316_s10 = smov (!%p134_p3, %s1805_s10), 1 }
   0xe   : > { %s1928_s11 = smul.u32 768, %s2316_s10  ;;  %s1863_s17 = sshll.u32 %s2316_s10, 7 }
   0xf   : > { %s2291_s20 = scalar_lea.vmem %s2314_s2, %s1863_s17 }
  0x10   : > { %s2106_s14 = scalar_lea.vmem %s2312_s0, %s1928_s11 }
  0x11   : > { %v146_v1 = vld [vmem:[%s2106_s14 + $0x8] sm:$0xff]  ;;  %v148_v3 = vld [vmem:[%s2106_s14 + $0x18] sm:$0xff]  ;;  %v145_v6 = vld [vmem:[%s2106_s14] sm:$0xff] }
  0x12   : > { %v178_v2 = vld [vmem:[%s2106_s14 + $0x108] sm:$0xff]  ;;  %v180_v5 = vld [vmem:[%s2106_s14 + $0x118] sm:$0xff]  ;;  %v177_v7 = vld [vmem:[%s2106_s14 + $0x100] sm:$0xff] }
  0x13   : > { %v1864_v4 = vpack.c.bf16 %v178_v2, %v146_v1  ;;  %v1868_v8 = vpack.c.bf16 %v180_v5, %v148_v3  ;;  %v1866_v9 = vpack.c.bf16 %v177_v7, %v145_v6  ;;  %v147_v10 = vld [vmem:[%s2106_s14 + $0x10] sm:$0xff]  ;;  %v210_v12 = vld [vmem:[%s2106_s14 + $0x208] sm:$0x7]  ;;  %v212_v14 = vld [vmem:[%s2106_s14 + $0x218] sm:$0x7] }
  0x14   : > { %v179_v11 = vld [vmem:[%s2106_s14 + $0x110] sm:$0xff]  ;;  %v209_v15 = vld [vmem:[%s2106_s14 + $0x200] sm:$0x7]  ;;  %v150_v17 = vld [vmem:[%s2106_s14 + $0x28] sm:$0xff] }
  0x15   : > { %1865 = vmatprep.subr.bf16.mxu0 %v1864_v4  ;;  %v1870_v13 = vpack.c.bf16 %v179_v11, %v147_v10  ;;  %1869 = vmatprep.subr.bf16.mxu1 %v1868_v8  ;;  %v182_v18 = vld [vmem:[%s2106_s14 + $0x128] sm:$0xff]  ;;  %v152_v19 = vld [vmem:[%s2106_s14 + $0x38] sm:$0xff]  ;;  %v149_v21 = vld [vmem:[%s2106_s14 + $0x20] sm:$0xff] }
  0x16   : > { %1867 = vmatpush1.bf16.msra.mxu0 %v1866_v9  ;;  %v184_v20 = vld [vmem:[%s2106_s14 + $0x138] sm:$0xff]  ;;  %v181_v22 = vld [vmem:[%s2106_s14 + $0x120] sm:$0xff]  ;;  %v211_v23 = vld [vmem:[%s2106_s14 + $0x210] sm:$0x7]  ;;  %v1872_v24 = vpack.c.bf16 %v182_v18, %v150_v17 }
  0x17   : > { %1871 = vmatpush1.bf16.msra.mxu1 %v1870_v13  ;;  %1813 = vmatprep.subr.msk.mxu0 %vm245_vm0, %v210_v12  ;;  %v151_v25 = vld [vmem:[%s2106_s14 + $0x30] sm:$0xff]  ;;  %v1876_v27 = vpack.c.bf16 %v184_v20, %v152_v19  ;;  %v1874_v28 = vpack.c.bf16 %v181_v22, %v149_v21  ;;  %v214_v30 = vld [vmem:[%s2106_s14 + $0x228] sm:$0x7]  ;;  %v216_v31 = vld [vmem:[%s2106_s14 + $0x238] sm:$0x7] }
  0x18   : > { %1816 = vmatprep.subr.msk.mxu1 %vm245_vm0, %v212_v14  ;;  %v183_v26 = vld [vmem:[%s2106_s14 + $0x130] sm:$0xff]  ;;  %v154_v32 = vld [vmem:[%s2106_s14 + $0x48] sm:$0xff]  ;;  %v156_v34 = vld [vmem:[%s2106_s14 + $0x58] sm:$0xff] }
  0x19   : > { %v1878_v29 = vpack.c.bf16 %v183_v26, %v151_v25  ;;  %v186_v33 = vld [vmem:[%s2106_s14 + $0x148] sm:$0xff]  ;;  %v188_v35 = vld [vmem:[%s2106_s14 + $0x158] sm:$0xff]  ;;  %v153_v36 = vld [vmem:[%s2106_s14 + $0x40] sm:$0xff] }
  0x1a   : > { %1814 = vmatpush1.msk.msra.mxu0 %vm245_vm0, %v209_v15  ;;  %v185_v37 = vld [vmem:[%s2106_s14 + $0x140] sm:$0xff]  ;;  %v155_v39 = vld [vmem:[%s2106_s14 + $0x50] sm:$0xff]  ;;  %v1880_v42 = vpack.c.bf16 %v186_v33, %v154_v32  ;;  %v1884_v43 = vpack.c.bf16 %v188_v35, %v156_v34  ;;  %v218_v46 = vld [vmem:[%s2106_s14 + $0x248] sm:$0x7] }
  0x1b   : > { %1817 = vmatpush1.msk.msra.mxu1 %vm245_vm0, %v211_v23  ;;  %1815 = vmatmul.mubr.msk.f32.vlgmr.msra.gmra.mrb[0].mxu0 %vm241_vm1, %v2122_v16  ;;  %v213_v38 = vld [vmem:[%s2106_s14 + $0x220] sm:$0x7]  ;;  %v187_v40 = vld [vmem:[%s2106_s14 + $0x150] sm:$0xff]  ;;  %v1882_v44 = vpack.c.bf16 %v185_v37, %v153_v36  ;;  %v220_v47 = vld [vmem:[%s2106_s14 + $0x258] sm:$0x7] }
  0x1c   : > { %1818 = vmatmul.mubr.msk.f32.vlgmr.msra.gmra.mrb[0].mxu1 %vm241_vm1, %v2122_v16  ;;  %1873 = vmatprep.subr.bf16.mxu0 %v1872_v24  ;;  %v215_v41 = vld [vmem:[%s2106_s14 + $0x230] sm:$0x7]  ;;  %v1886_v45 = vpack.c.bf16 %v187_v40, %v155_v39  ;;  %v158_v48 = vld [vmem:[%s2106_s14 + $0x68] sm:$0xff]  ;;  %v160_v50 = vld [vmem:[%s2106_s14 + $0x78] sm:$0xff] }
  0x1d   : > { %1877 = vmatprep.subr.bf16.mxu1 %v1876_v27  ;;  %1875 = vmatpush1.bf16.msra.mxu0 %v1874_v28  ;;  %v190_v49 = vld [vmem:[%s2106_s14 + $0x168] sm:$0xff]  ;;  %v192_v51 = vld [vmem:[%s2106_s14 + $0x178] sm:$0xff]  ;;  %v157_v52 = vld [vmem:[%s2106_s14 + $0x60] sm:$0xff] }
  0x1e   : > { %1879 = vmatpush1.bf16.msra.mxu1 %v1878_v29  ;;  %1819 = vmatprep.subr.msk.mxu0 %vm245_vm0, %v214_v30  ;;  %v189_v53 = vld [vmem:[%s2106_s14 + $0x160] sm:$0xff]  ;;  %v159_v55 = vld [vmem:[%s2106_s14 + $0x70] sm:$0xff]  ;;  %v1888_v58 = vpack.c.bf16 %v190_v49, %v158_v48  ;;  %v1892_v59 = vpack.c.bf16 %v192_v51, %v160_v50  ;;  %v222_v62 = vld [vmem:[%s2106_s14 + $0x268] sm:$0x7] }
  0x1f   : > { %1822 = vmatprep.subr.msk.mxu1 %vm245_vm0, %v216_v31  ;;  %548 = vmatprep.mubr.f32.mxu0 %v2074_v0  ;;  %v217_v54 = vld [vmem:[%s2106_s14 + $0x240] sm:$0x7]  ;;  %v191_v56 = vld [vmem:[%s2106_s14 + $0x170] sm:$0xff]  ;;  %v1890_v60 = vpack.c.bf16 %v189_v53, %v157_v52  ;;  %v224_v63 = vld [vmem:[%s2106_s14 + $0x278] sm:$0x7] }
  0x20   : > { %619 = vmatprep.mubr.f32.mxu1 %v2074_v0  ;;  %v219_v57 = vld [vmem:[%s2106_s14 + $0x250] sm:$0x7]  ;;  %v1894_v61 = vpack.c.bf16 %v191_v56, %v159_v55  ;;  %v162_v1 = vld [vmem:[%s2106_s14 + $0x88] sm:$0xff]  ;;  %v164_v3 = vld [vmem:[%s2106_s14 + $0x98] sm:$0xff] }
  0x21   : > { %1820 = vmatpush1.msk.msra.mxu0 %vm245_vm0, %v213_v38  ;;  %v194_v2 = vld [vmem:[%s2106_s14 + $0x188] sm:$0xff]  ;;  %v196_v4 = vld [vmem:[%s2106_s14 + $0x198] sm:$0xff]  ;;  %v161_v5 = vld [vmem:[%s2106_s14 + $0x80] sm:$0xff] }
  0x22   : > { %1823 = vmatpush1.msk.msra.mxu1 %vm245_vm0, %v215_v41  ;;  %1821 = vmatmul.mubr.msk.f32.vlgmr.msra.gmra.mrb[2].mxu0 %vm241_vm1, %v2122_v16  ;;  %v193_v6 = vld [vmem:[%s2106_s14 + $0x180] sm:$0xff]  ;;  %v163_v8 = vld [vmem:[%s2106_s14 + $0x90] sm:$0xff]  ;;  %v1896_v11 = vpack.c.bf16 %v194_v2, %v162_v1  ;;  %v1900_v12 = vpack.c.bf16 %v196_v4, %v164_v3  ;;  %v226_v15 = vld [vmem:[%s2106_s14 + $0x288] sm:$0x7] }
  0x23   : > { %1824 = vmatmul.mubr.msk.f32.vlgmr.msra.gmra.mrb[2].mxu1 %vm241_vm1, %v2122_v16  ;;  %1881 = vmatprep.subr.bf16.mxu0 %v1880_v42  ;;  %v221_v7 = vld [vmem:[%s2106_s14 + $0x260] sm:$0x7]  ;;  %v195_v9 = vld [vmem:[%s2106_s14 + $0x190] sm:$0xff]  ;;  %v1898_v13 = vpack.c.bf16 %v193_v6, %v161_v5  ;;  %v228_v17 = vld [vmem:[%s2106_s14 + $0x298] sm:$0x7] }
  0x24   : > { %1885 = vmatprep.subr.bf16.mxu1 %v1884_v43  ;;  %1883 = vmatpush1.bf16.msra.mxu0 %v1882_v44  ;;  %v223_v10 = vld [vmem:[%s2106_s14 + $0x270] sm:$0x7]  ;;  %v1902_v14 = vpack.c.bf16 %v195_v9, %v163_v8  ;;  %v166_v18 = vld [vmem:[%s2106_s14 + $0xa8] sm:$0xff]  ;;  %v168_v20 = vld [vmem:[%s2106_s14 + $0xb8] sm:$0xff] }
  0x25   : > { %1887 = vmatpush1.bf16.msra.mxu1 %v1886_v45  ;;  %1825 = vmatprep.subr.msk.mxu0 %vm245_vm0, %v218_v46  ;;  %v198_v19 = vld [vmem:[%s2106_s14 + $0x1a8] sm:$0xff]  ;;  %v200_v21 = vld [vmem:[%s2106_s14 + $0x1b8] sm:$0xff]  ;;  %v165_v22 = vld [vmem:[%s2106_s14 + $0xa0] sm:$0xff] }
  0x26   : > { %1828 = vmatprep.subr.msk.mxu1 %vm245_vm0, %v220_v47  ;;  %690 = vmatprep.mubr.f32.mxu0 %v2074_v0  ;;  %v197_v23 = vld [vmem:[%s2106_s14 + $0x1a0] sm:$0xff]  ;;  %v167_v25 = vld [vmem:[%s2106_s14 + $0xb0] sm:$0xff]  ;;  %v1904_v28 = vpack.c.bf16 %v198_v19, %v166_v18  ;;  %v1908_v29 = vpack.c.bf16 %v200_v21, %v168_v20  ;;  %v230_v32 = vld [vmem:[%s2106_s14 + $0x2a8] sm:$0x7] }
  0x27   : > { %761 = vmatprep.mubr.f32.mxu1 %v2074_v0  ;;  %v225_v24 = vld [vmem:[%s2106_s14 + $0x280] sm:$0x7]  ;;  %v199_v26 = vld [vmem:[%s2106_s14 + $0x1b0] sm:$0xff]  ;;  %v1906_v30 = vpack.c.bf16 %v197_v23, %v165_v22  ;;  %v232_v33 = vld [vmem:[%s2106_s14 + $0x2b8] sm:$0x7] }
  0x28   : > { %1826 = vmatpush1.msk.msra.mxu0 %vm245_vm0, %v217_v54  ;;  %v227_v27 = vld [vmem:[%s2106_s14 + $0x290] sm:$0x7]  ;;  %v1910_v31 = vpack.c.bf16 %v199_v26, %v167_v25  ;;  %v170_v34 = vld [vmem:[%s2106_s14 + $0xc8] sm:$0xff]  ;;  %v172_v36 = vld [vmem:[%s2106_s14 + $0xd8] sm:$0xff] }
  0x29   : > { %1829 = vmatpush1.msk.msra.mxu1 %vm245_vm0, %v219_v57  ;;  %1827 = vmatmul.mubr.msk.f32.vlgmr.msra.gmra.mrb[4].mxu0 %vm241_vm1, %v2122_v16  ;;  %v202_v35 = vld [vmem:[%s2106_s14 + $0x1c8] sm:$0xff]  ;;  %v204_v37 = vld [vmem:[%s2106_s14 + $0x1d8] sm:$0xff]  ;;  %v169_v38 = vld [vmem:[%s2106_s14 + $0xc0] sm:$0xff] }
  0x2a   : > { %1830 = vmatmul.mubr.msk.f32.vlgmr.msra.gmra.mrb[4].mxu1 %vm241_vm1, %v2122_v16  ;;  %1889 = vmatprep.subr.bf16.mxu0 %v1888_v58  ;;  %v201_v39 = vld [vmem:[%s2106_s14 + $0x1c0] sm:$0xff]  ;;  %v171_v41 = vld [vmem:[%s2106_s14 + $0xd0] sm:$0xff]  ;;  %v1912_v44 = vpack.c.bf16 %v202_v35, %v170_v34  ;;  %v1916_v45 = vpack.c.bf16 %v204_v37, %v172_v36  ;;  %v234_v48 = vld [vmem:[%s2106_s14 + $0x2c8] sm:$0x7] }
  0x2b   : > { %1893 = vmatprep.subr.bf16.mxu1 %v1892_v59  ;;  %1891 = vmatpush1.bf16.msra.mxu0 %v1890_v60  ;;  %v229_v40 = vld [vmem:[%s2106_s14 + $0x2a0] sm:$0x7]  ;;  %v203_v42 = vld [vmem:[%s2106_s14 + $0x1d0] sm:$0xff]  ;;  %v1914_v46 = vpack.c.bf16 %v201_v39, %v169_v38  ;;  %v236_v49 = vld [vmem:[%s2106_s14 + $0x2d8] sm:$0x7] }
  0x2c   : > { %1895 = vmatpush1.bf16.msra.mxu1 %v1894_v61  ;;  %1831 = vmatprep.subr.msk.mxu0 %vm245_vm0, %v222_v62  ;;  %v231_v43 = vld [vmem:[%s2106_s14 + $0x2b0] sm:$0x7]  ;;  %v1918_v47 = vpack.c.bf16 %v203_v42, %v171_v41  ;;  %v174_v50 = vld [vmem:[%s2106_s14 + $0xe8] sm:$0xff]  ;;  %v176_v52 = vld [vmem:[%s2106_s14 + $0xf8] sm:$0xff] }
  0x2d   : > { %1834 = vmatprep.subr.msk.mxu1 %vm245_vm0, %v224_v63  ;;  %832 = vmatprep.mubr.f32.mxu0 %v2074_v0  ;;  %v206_v51 = vld [vmem:[%s2106_s14 + $0x1e8] sm:$0xff]  ;;  %v208_v53 = vld [vmem:[%s2106_s14 + $0x1f8] sm:$0xff]  ;;  %v173_v54 = vld [vmem:[%s2106_s14 + $0xe0] sm:$0xff] }
  0x2e   : > { %903 = vmatprep.mubr.f32.mxu1 %v2074_v0  ;;  %v205_v55 = vld [vmem:[%s2106_s14 + $0x1e0] sm:$0xff]  ;;  %v175_v57 = vld [vmem:[%s2106_s14 + $0xf0] sm:$0xff]  ;;  %v1920_v60 = vpack.c.bf16 %v206_v51, %v174_v50  ;;  %v1924_v61 = vpack.c.bf16 %v208_v53, %v176_v52  ;;  %v238_v1 = vld [vmem:[%s2106_s14 + $0x2e8] sm:$0x7] }
  0x2f   : > { %1832 = vmatpush1.msk.msra.mxu0 %vm245_vm0, %v221_v7  ;;  %v233_v56 = vld [vmem:[%s2106_s14 + $0x2c0] sm:$0x7]  ;;  %v207_v58 = vld [vmem:[%s2106_s14 + $0x1f0] sm:$0xff]  ;;  %v1922_v62 = vpack.c.bf16 %v205_v55, %v173_v54  ;;  %v240_v2 = vld [vmem:[%s2106_s14 + $0x2f8] sm:$0x7] }
  0x30   : > { %1835 = vmatpush1.msk.msra.mxu1 %vm245_vm0, %v223_v10  ;;  %1833 = vmatmul.mubr.msk.f32.vlgmr.msra.gmra.mrb[6].mxu0 %vm241_vm1, %v2122_v16  ;;  %v235_v59 = vld [vmem:[%s2106_s14 + $0x2d0] sm:$0x7]  ;;  %v1926_v63 = vpack.c.bf16 %v207_v58, %v175_v57  ;;  %v237_v3 = vld [vmem:[%s2106_s14 + $0x2e0] sm:$0x7] }
  0x31   : > { %1836 = vmatmul.mubr.msk.f32.vlgmr.msra.gmra.mrb[6].mxu1 %vm241_vm1, %v2122_v16  ;;  %1897 = vmatprep.subr.bf16.mxu0 %v1896_v11  ;;  %v239_v4 = vld [vmem:[%s2106_s14 + $0x2f0] sm:$0x7] }
  0x32   : > { %1901 = vmatprep.subr.bf16.mxu1 %v1900_v12  ;;  %1899 = vmatpush1.bf16.msra.mxu0 %v1898_v13 }
  0x33   : > { %1903 = vmatpush1.bf16.msra.mxu1 %v1902_v14  ;;  %1837 = vmatprep.subr.msk.mxu0 %vm245_vm0, %v226_v15 }
  0x34   : > { %1840 = vmatprep.subr.msk.mxu1 %vm245_vm0, %v228_v17  ;;  %974 = vmatprep.mubr.f32.mxu0 %v2074_v0 }
  0x35   : > { %1045 = vmatprep.mubr.f32.mxu1 %v2074_v0 }
  0x36   : > { %1838 = vmatpush1.msk.msra.mxu0 %vm245_vm0, %v225_v24 }
  0x37   : > { %1841 = vmatpush1.msk.msra.mxu1 %vm245_vm0, %v227_v27  ;;  %1839 = vmatmul.mubr.msk.f32.vlgmr.msra.gmra.mrb[8].mxu0 %vm241_vm1, %v2122_v16 }
  0x38   : > { %1842 = vmatmul.mubr.msk.f32.vlgmr.msra.gmra.mrb[8].mxu1 %vm241_vm1, %v2122_v16  ;;  %1905 = vmatprep.subr.bf16.mxu0 %v1904_v28 }
  0x39   : > { %1909 = vmatprep.subr.bf16.mxu1 %v1908_v29  ;;  %1907 = vmatpush1.bf16.msra.mxu0 %v1906_v30 }
  0x3a   : > { %1911 = vmatpush1.bf16.msra.mxu1 %v1910_v31  ;;  %1843 = vmatprep.subr.msk.mxu0 %vm245_vm0, %v230_v32 }
  0x3b   : > { %1846 = vmatprep.subr.msk.mxu1 %vm245_vm0, %v232_v33  ;;  %1116 = vmatprep.mubr.f32.mxu0 %v2074_v0 }
  0x3c   : > { %1187 = vmatprep.mubr.f32.mxu1 %v2074_v0 }
  0x3d   : > { %1844 = vmatpush1.msk.msra.mxu0 %vm245_vm0, %v229_v40 }
  0x3e   : > { %1847 = vmatpush1.msk.msra.mxu1 %vm245_vm0, %v231_v43  ;;  %1845 = vmatmul.mubr.msk.f32.vlgmr.msra.gmra.mrb[10].mxu0 %vm241_vm1, %v2122_v16 }
  0x3f   : > { %1848 = vmatmul.mubr.msk.f32.vlgmr.msra.gmra.mrb[10].mxu1 %vm241_vm1, %v2122_v16  ;;  %1913 = vmatprep.subr.bf16.mxu0 %v1912_v44 }
  0x40   : > { %1917 = vmatprep.subr.bf16.mxu1 %v1916_v45  ;;  %1915 = vmatpush1.bf16.msra.mxu0 %v1914_v46 }
  0x41   : > { %1919 = vmatpush1.bf16.msra.mxu1 %v1918_v47  ;;  %1849 = vmatprep.subr.msk.mxu0 %vm245_vm0, %v234_v48 }
  0x42   : > { %1852 = vmatprep.subr.msk.mxu1 %vm245_vm0, %v236_v49  ;;  %1258 = vmatprep.mubr.f32.mxu0 %v2074_v0 }
  0x43   : > { %1329 = vmatprep.mubr.f32.mxu1 %v2074_v0 }
  0x44   : > { %1850 = vmatpush1.msk.msra.mxu0 %vm245_vm0, %v233_v56 }
  0x45   : > { %1853 = vmatpush1.msk.msra.mxu1 %vm245_vm0, %v235_v59  ;;  %1851 = vmatmul.mubr.msk.f32.vlgmr.msra.gmra.mrb[12].mxu0 %vm241_vm1, %v2122_v16 }
  0x46   : > { %1854 = vmatmul.mubr.msk.f32.vlgmr.msra.gmra.mrb[12].mxu1 %vm241_vm1, %v2122_v16  ;;  %1921 = vmatprep.subr.bf16.mxu0 %v1920_v60 }
  0x47   : > { %1925 = vmatprep.subr.bf16.mxu1 %v1924_v61  ;;  %1923 = vmatpush1.bf16.msra.mxu0 %v1922_v62 }
  0x48   : > { %1927 = vmatpush1.bf16.msra.mxu1 %v1926_v63  ;;  %1855 = vmatprep.subr.msk.mxu0 %vm245_vm0, %v238_v1 }
  0x49   : > { %1858 = vmatprep.subr.msk.mxu1 %vm245_vm0, %v240_v2  ;;  %1400 = vmatprep.mubr.f32.mxu0 %v2074_v0 }
  0x4a   : > { %1471 = vmatprep.mubr.f32.mxu1 %v2074_v0 }
  0x4b   : > { %1856 = vmatpush1.msk.msra.mxu0 %vm245_vm0, %v237_v3 }
  0x4c   : > { %1859 = vmatpush1.msk.msra.mxu1 %vm245_vm0, %v239_v4  ;;  %1857 = vmatmul.mubr.msk.f32.vlgmr.msra.gmra.mrb[14].mxu0 %vm241_vm1, %v2122_v16 }
  0x4d   : > { %1860 = vmatmul.mubr.msk.f32.vlgmr.msra.gmra.mrb[14].mxu1 %vm241_vm1, %v2122_v16 }
  0xee   : > { %v408_v5 = vpop.f32.mrb[0].mxu0 }
  0xef   : > { %v1478_v6 = vsub.f32 0.0, %v408_v5  ;;  %v479_v7 = vpop.f32.mrb[0].mxu1  ;;  %v410_v8 = vpop.f32.mrb[1].mxu0 }
  0xf0   : > { %v1480_v9 = vsub.f32 0.0, %v479_v7  ;;  %v1479_v10 = vsub.f32 0.0, %v410_v8  ;;  %v481_v11 = vpop.f32.mrb[1].mxu1 }
  0xf1   : > { %v1510_v12 = vmul.f32 1.442695, %v1478_v6  ;;  %v1481_v13 = vsub.f32 0.0, %v481_v11 }
  0xf2   : > { %v1514_v0 = vmul.f32 1.442695, %v1480_v9  ;;  %v1512_v14 = vmul.f32 1.442695, %v1479_v10 }
  0xf3   : > { %1938 = vpow2.f32 %v1510_v12  ;;  %v1516_v15 = vmul.f32 1.442695, %v1481_v13 }
  0xf4   : > { %1940 = vpow2.f32 %v1514_v0 }
  0xf5   : > { %1942 = vpow2.f32 %v1512_v14  ;;  %v550_v17 = vpop.f32.mrb[2].mxu0 }
  0xf6   : > { %1944 = vpow2.f32 %v1516_v15  ;;  %v1482_v18 = vsub.f32 0.0, %v550_v17  ;;  %v621_v19 = vpop.f32.mrb[2].mxu1  ;;  %v552_v16 = vpop.f32.mrb[3].mxu0 }
  0xf7   : > { %v1484_v20 = vsub.f32 0.0, %v621_v19  ;;  %v1483_v21 = vsub.f32 0.0, %v552_v16  ;;  %v623_v22 = vpop.f32.mrb[3].mxu1 }
  0xf8   : > { %v1518_v23 = vmul.f32 1.442695, %v1482_v18  ;;  %v1485_v24 = vsub.f32 0.0, %v623_v22 }
  0xf9   : > { %v1522_v25 = vmul.f32 1.442695, %v1484_v20  ;;  %v1520_v26 = vmul.f32 1.442695, %v1483_v21 }
  0xfa   : > { %1946 = vpow2.f32 %v1518_v23  ;;  %v1524_v27 = vmul.f32 1.442695, %v1485_v24 }
  0xfb   : > { %1948 = vpow2.f32 %v1522_v25 }
  0xfc   : > { %1950 = vpow2.f32 %v1520_v26  ;;  %v692_v28 = vpop.f32.mrb[4].mxu0 }
  0xfd   : > { %v1939_v29 = vpop.eup %1938  ;;  %1952 = vpow2.f32 %v1524_v27  ;;  %v1486_v30 = vsub.f32 0.0, %v692_v28  ;;  %v763_v31 = vpop.f32.mrb[4].mxu1 }
  0xfe   : > { %v694_v32 = vpop.f32.mrb[5].mxu0  ;;  %v1941_v33 = vpop.eup %1940  ;;  %v1574_v34 = vadd.f32 1.0, %v1939_v29  ;;  %v1488_v35 = vsub.f32 0.0, %v763_v31 }
  0xff   : > { %v1487_v36 = vsub.f32 0.0, %v694_v32  ;;  %v765_v37 = vpop.f32.mrb[5].mxu1  ;;  %v1943_v38 = vpop.eup %1942  ;;  %v1576_v39 = vadd.f32 1.0, %v1941_v33  ;;  %v1526_v42 = vmul.f32 1.442695, %v1486_v30 }
 0x100   : > { %v1945_v40 = vpop.eup %1944  ;;  %1954 = vrcp.f32 %v1574_v34  ;;  %v1575_v41 = vadd.f32 1.0, %v1943_v38  ;;  %v1530_v44 = vmul.f32 1.442695, %v1488_v35  ;;  %v1489_v46 = vsub.f32 0.0, %v765_v37 }
 0x101   : > { %1956 = vrcp.f32 %v1576_v39  ;;  %v1577_v43 = vadd.f32 1.0, %v1945_v40  ;;  %v1528_v45 = vmul.f32 1.442695, %v1487_v36 }
 0x102   : > { %1958 = vrcp.f32 %v1575_v41  ;;  %v1532_v61 = vmul.f32 1.442695, %v1489_v46 }
 0x103   : > { %1960 = vrcp.f32 %v1577_v43  ;;  %v834_v47 = vpop.f32.mrb[6].mxu0 }
 0x104   : > { %v1947_v48 = vpop.eup %1946  ;;  %1962 = vpow2.f32 %v1526_v42  ;;  %v1490_v49 = vsub.f32 0.0, %v834_v47  ;;  %v905_v50 = vpop.f32.mrb[6].mxu1 }
 0x105   : > { %v836_v51 = vpop.f32.mrb[7].mxu0  ;;  %v1949_v52 = vpop.eup %1948  ;;  %v1578_v53 = vadd.f32 1.0, %v1947_v48  ;;  %1964 = vpow2.f32 %v1530_v44  ;;  %v1492_v54 = vsub.f32 0.0, %v905_v50 }
 0x106   : > { %v907_v55 = vpop.f32.mrb[7].mxu1  ;;  %v1951_v56 = vpop.eup %1950  ;;  %v1580_v57 = vadd.f32 1.0, %v1949_v52  ;;  %1966 = vpow2.f32 %v1528_v45  ;;  %v1491_v58 = vsub.f32 0.0, %v836_v51  ;;  %v1534_v1 = vmul.f32 1.442695, %v1490_v49 }
 0x107   : > { %v1953_v59 = vpop.eup %1952  ;;  %1968 = vrcp.f32 %v1578_v53  ;;  %v1579_v60 = vadd.f32 1.0, %v1951_v56  ;;  %v1493_v62 = vsub.f32 0.0, %v907_v55  ;;  %v1538_v2 = vmul.f32 1.442695, %v1492_v54 }
 0x108   : > { %1970 = vrcp.f32 %v1580_v57  ;;  %v1581_v63 = vadd.f32 1.0, %v1953_v59  ;;  %v1536_v4 = vmul.f32 1.442695, %v1491_v58 }
 0x109   : > { %1972 = vrcp.f32 %v1579_v60  ;;  %v1540_v7 = vmul.f32 1.442695, %v1493_v62 }
 0x10a   : > { %v1955_v3 = vpop.eup %1954  ;;  %1974 = vrcp.f32 %v1581_v63  ;;  %v976_v5 = vpop.f32.mrb[8].mxu0 }
 0x10b   : > { %v1957_v6 = vpop.eup %1956  ;;  %1976 = vpow2.f32 %v1532_v61  ;;  %v1494_v8 = vsub.f32 0.0, %v976_v5  ;;  %v1047_v9 = vpop.f32.mrb[8].mxu1 }
 0x10c   : > { %v978_v10 = vpop.f32.mrb[9].mxu0  ;;  %v1959_v11 = vpop.eup %1958  ;;  %1978 = vpow2.f32 %v1534_v1  ;;  %v1496_v12 = vsub.f32 0.0, %v1047_v9 }
 0x10d   : > { %v1049_v13 = vpop.f32.mrb[9].mxu1  ;;  %v1961_v0 = vpop.eup %1960  ;;  %v1702_v14 = vcombine.low %v1955_v3, %v1959_v11  ;;  %1980 = vpow2.f32 %v1538_v2  ;;  %v1542_v15 = vmul.f32 1.442695, %v1494_v8  ;;  %v1495_v17 = vsub.f32 0.0, %v978_v10 }
 0x10e   : > { %v1963_v18 = vpop.eup %1962  ;;  %v1703_v19 = vcombine.low %v1957_v6, %v1961_v0  ;;  %1982 = vpow2.f32 %v1536_v4  ;;  %v1497_v16 = vsub.f32 0.0, %v1049_v13  ;;  %v1546_v24 = vmul.f32 1.442695, %v1496_v12 }
 0x10f   : > { %v1965_v20 = vpop.eup %1964  ;;  %1734 = vst [vmem:[%s2291_s20] sm:$0x77] %v1702_v14  ;;  %v1582_v21 = vadd.f32 1.0, %v1963_v18  ;;  %1984 = vpow2.f32 %v1540_v7  ;;  %v1544_v27 = vmul.f32 1.442695, %v1495_v17 }
 0x110   : > { %v1967_v22 = vpop.eup %1966  ;;  %1735 = vst [vmem:[%s2291_s20 + $0x8] sm:$0x77] %v1703_v19  ;;  %v1584_v23 = vadd.f32 1.0, %v1965_v20  ;;  %1986 = vpow2.f32 %v1542_v15  ;;  %v1548_v30 = vmul.f32 1.442695, %v1497_v16 }
 0x111   : > { %v1969_v25 = vpop.eup %1968  ;;  %1988 = vrcp.f32 %v1582_v21  ;;  %v1583_v26 = vadd.f32 1.0, %v1967_v22  ;;  %v1118_v28 = vpop.f32.mrb[10].mxu0 }
 0x112   : > { %v1971_v29 = vpop.eup %1970  ;;  %1990 = vrcp.f32 %v1584_v23  ;;  %v1498_v31 = vsub.f32 0.0, %v1118_v28  ;;  %v1189_v32 = vpop.f32.mrb[10].mxu1 }
 0x113   : > { %v1120_v33 = vpop.f32.mrb[11].mxu0  ;;  %v1973_v34 = vpop.eup %1972  ;;  %1992 = vrcp.f32 %v1583_v26  ;;  %v1500_v43 = vsub.f32 0.0, %v1189_v32 }
 0x114   : > { %v1191_v35 = vpop.f32.mrb[11].mxu1  ;;  %v1975_v36 = vpop.eup %1974  ;;  %v1704_v37 = vcombine.low %v1969_v25, %v1973_v34  ;;  %1994 = vpow2.f32 %v1546_v24  ;;  %v1550_v38 = vmul.f32 1.442695, %v1498_v31  ;;  %v1499_v46 = vsub.f32 0.0, %v1120_v33 }
 0x115   : > { %v1977_v39 = vpop.eup %1976  ;;  %v1705_v40 = vcombine.low %v1971_v29, %v1975_v36  ;;  %1996 = vpow2.f32 %v1544_v27  ;;  %v1501_v49 = vsub.f32 0.0, %v1191_v35  ;;  %v1554_v57 = vmul.f32 1.442695, %v1500_v43 }
 0x116   : > { %v1979_v41 = vpop.eup %1978  ;;  %1736 = vst [vmem:[%s2291_s20 + $0x10] sm:$0x77] %v1704_v37  ;;  %v1585_v42 = vadd.f32 1.0, %v1977_v39  ;;  %1998 = vpow2.f32 %v1548_v30  ;;  %v1552_v61 = vmul.f32 1.442695, %v1499_v46 }
 0x117   : > { %v1981_v44 = vpop.eup %1980  ;;  %1737 = vst [vmem:[%s2291_s20 + $0x18] sm:$0x77] %v1705_v40  ;;  %v1586_v45 = vadd.f32 1.0, %v1979_v41  ;;  %2000 = vpow2.f32 %v1550_v38  ;;  %v1556_v63 = vmul.f32 1.442695, %v1501_v49 }
 0x118   : > { %v1983_v47 = vpop.eup %1982  ;;  %2002 = vrcp.f32 %v1585_v42  ;;  %v1588_v48 = vadd.f32 1.0, %v1981_v44  ;;  %v1260_v50 = vpop.f32.mrb[12].mxu0 }
 0x119   : > { %v1985_v51 = vpop.eup %1984  ;;  %2004 = vrcp.f32 %v1586_v45  ;;  %v1587_v52 = vadd.f32 1.0, %v1983_v47  ;;  %v1331_v53 = vpop.f32.mrb[12].mxu1  ;;  %v1502_v2 = vsub.f32 0.0, %v1260_v50 }
 0x11a   : > { %v1262_v54 = vpop.f32.mrb[13].mxu0  ;;  %v1987_v55 = vpop.eup %1986  ;;  %2006 = vrcp.f32 %v1588_v48  ;;  %v1589_v56 = vadd.f32 1.0, %v1985_v51  ;;  %v1504_v5 = vsub.f32 0.0, %v1331_v53 }
 0x11b   : > { %v1333_v58 = vpop.f32.mrb[13].mxu1  ;;  %v1989_v59 = vpop.eup %1988  ;;  %2008 = vrcp.f32 %v1587_v52  ;;  %v1590_v60 = vadd.f32 1.0, %v1987_v55  ;;  %v1503_v8 = vsub.f32 0.0, %v1262_v54  ;;  %v1558_v17 = vmul.f32 1.442695, %v1502_v2 }
 0x11c   : > { %v1991_v62 = vpop.eup %1990  ;;  %2010 = vrcp.f32 %v1589_v56  ;;  %v1505_v12 = vsub.f32 0.0, %v1333_v58  ;;  %v1562_v21 = vmul.f32 1.442695, %v1504_v5 }
 0x11d   : > { %v1993_v1 = vpop.eup %1992  ;;  %2012 = vrcp.f32 %v1590_v60  ;;  %v1560_v25 = vmul.f32 1.442695, %v1503_v8 }
 0x11e   : > { %v1995_v3 = vpop.eup %1994  ;;  %v1706_v4 = vcombine.low %v1989_v59, %v1993_v1  ;;  %2014 = vpow2.f32 %v1554_v57  ;;  %v1564_v27 = vmul.f32 1.442695, %v1505_v12 }
 0x11f   : > { %v1997_v6 = vpop.eup %1996  ;;  %v1592_v7 = vadd.f32 1.0, %v1995_v3  ;;  %2016 = vpow2.f32 %v1552_v61  ;;  %v1402_v9 = vpop.f32.mrb[14].mxu0 }
 0x120   : > { %v1999_v10 = vpop.eup %1998  ;;  %1738 = vst [vmem:[%s2291_s20 + $0x20] sm:$0x77] %v1706_v4  ;;  %v1591_v11 = vadd.f32 1.0, %v1997_v6  ;;  %2018 = vpow2.f32 %v1556_v63  ;;  %v1473_v13 = vpop.f32.mrb[14].mxu1  ;;  %v1506_v18 = vsub.f32 0.0, %v1402_v9 }
 0x121   : > { %v1404_v0 = vpop.f32.mrb[15].mxu0  ;;  %v2001_v14 = vpop.eup %2000  ;;  %2020 = vrcp.f32 %v1592_v7  ;;  %v1593_v15 = vadd.f32 1.0, %v1999_v10  ;;  %v1508_v22 = vsub.f32 0.0, %v1473_v13 }
 0x122   : > { %v1475_v19 = vpop.f32.mrb[15].mxu1  ;;  %v2003_v16 = vpop.eup %2002  ;;  %2022 = vrcp.f32 %v1591_v11  ;;  %v1594_v20 = vadd.f32 1.0, %v2001_v14  ;;  %v1566_v29 = vmul.f32 1.442695, %v1506_v18  ;;  %v1507_v33 = vsub.f32 0.0, %v1404_v0 }
 0x123   : > { %v2005_v23 = vpop.eup %2004  ;;  %v1707_v24 = vcombine.low %v1991_v62, %v2003_v16  ;;  %2024 = vrcp.f32 %v1593_v15  ;;  %v1570_v32 = vmul.f32 1.442695, %v1508_v22  ;;  %v1509_v36 = vsub.f32 0.0, %v1475_v19 }
 0x124   : > { %v2007_v26 = vpop.eup %2006  ;;  %2026 = vrcp.f32 %v1594_v20  ;;  %v1568_v42 = vmul.f32 1.442695, %v1507_v33 }
 0x125   : > { %v2009_v28 = vpop.eup %2008  ;;  %1739 = vst [vmem:[%s2291_s20 + $0x28] sm:$0x77] %v1707_v24  ;;  %2028 = vpow2.f32 %v1558_v17  ;;  %v1572_v45 = vmul.f32 1.442695, %v1509_v36 }
 0x126   : > { %v2011_v30 = vpop.eup %2010  ;;  %v1708_v31 = vcombine.low %v2005_v23, %v2009_v28  ;;  %2030 = vpow2.f32 %v1562_v21 }
 0x127   : > { %v2013_v34 = vpop.eup %2012  ;;  %v1709_v35 = vcombine.low %v2007_v26, %v2011_v30  ;;  %2032 = vpow2.f32 %v1560_v25 }
 0x128   : > { %v2015_v37 = vpop.eup %2014  ;;  %1740 = vst [vmem:[%s2291_s20 + $0x30] sm:$0x77] %v1708_v31  ;;  %2034 = vpow2.f32 %v1564_v27 }
 0x129   : > { %v2017_v38 = vpop.eup %2016  ;;  %1741 = vst [vmem:[%s2291_s20 + $0x38] sm:$0x77] %v1709_v35  ;;  %v1596_v39 = vadd.f32 1.0, %v2015_v37  ;;  %2036 = vpow2.f32 %v1566_v29 }
 0x12a   : > { %v2019_v40 = vpop.eup %2018  ;;  %v1595_v41 = vadd.f32 1.0, %v2017_v38  ;;  %2038 = vpow2.f32 %v1570_v32 }
 0x12b   : > { %v2021_v43 = vpop.eup %2020  ;;  %2040 = vrcp.f32 %v1596_v39  ;;  %v1597_v44 = vadd.f32 1.0, %v2019_v40 }
 0x12c   : > { %v2023_v46 = vpop.eup %2022  ;;  %2042 = vrcp.f32 %v1595_v41 }
 0x12d   : > { %v2025_v47 = vpop.eup %2024  ;;  %v1710_v48 = vcombine.low %v2013_v34, %v2023_v46  ;;  %2044 = vrcp.f32 %v1597_v44 }
 0x12e   : > { %v2027_v49 = vpop.eup %2026  ;;  %v1711_v50 = vcombine.low %v2021_v43, %v2025_v47  ;;  %2046 = vpow2.f32 %v1568_v42 }
 0x12f   : > { %v2029_v51 = vpop.eup %2028  ;;  %1742 = vst [vmem:[%s2291_s20 + $0x40] sm:$0x77] %v1710_v48  ;;  %2048 = vpow2.f32 %v1572_v45 }
 0x130   : > { %v2031_v52 = vpop.eup %2030  ;;  %1743 = vst [vmem:[%s2291_s20 + $0x48] sm:$0x77] %v1711_v50  ;;  %v1598_v53 = vadd.f32 1.0, %v2029_v51 }
 0x131   : > { %v2033_v54 = vpop.eup %2032  ;;  %v1600_v55 = vadd.f32 1.0, %v2031_v52 }
 0x132   : > { %v2035_v56 = vpop.eup %2034  ;;  %2050 = vrcp.f32 %v1598_v53  ;;  %v1599_v57 = vadd.f32 1.0, %v2033_v54 }
 0x133   : > { %v2037_v58 = vpop.eup %2036  ;;  %2052 = vrcp.f32 %v1600_v55  ;;  %v1601_v59 = vadd.f32 1.0, %v2035_v56 }
 0x134   : > { %v2039_v60 = vpop.eup %2038  ;;  %2054 = vrcp.f32 %v1599_v57  ;;  %v1602_v62 = vadd.f32 1.0, %v2037_v58 }
 0x135   : > { %v2041_v61 = vpop.eup %2040  ;;  %2056 = vrcp.f32 %v1601_v59  ;;  %v1604_v1 = vadd.f32 1.0, %v2039_v60 }
 0x136   : > { %v2043_v63 = vpop.eup %2042  ;;  %2058 = vrcp.f32 %v1602_v62 }
 0x137   : > { %v2045_v2 = vpop.eup %2044  ;;  %v1712_v3 = vcombine.low %v2027_v49, %v2043_v63  ;;  %2060 = vrcp.f32 %v1604_v1 }
 0x138   : > { %v2047_v4 = vpop.eup %2046  ;;  %v1713_v5 = vcombine.low %v2041_v61, %v2045_v2 }
 0x139   : > { %v2049_v6 = vpop.eup %2048  ;;  %1744 = vst [vmem:[%s2291_s20 + $0x50] sm:$0x77] %v1712_v3  ;;  %v1603_v7 = vadd.f32 1.0, %v2047_v4 }
 0x13a   : > { %1745 = vst [vmem:[%s2291_s20 + $0x58] sm:$0x77] %v1713_v5  ;;  %v1605_v8 = vadd.f32 1.0, %v2049_v6 }
 0x13b   : > { %2062 = vrcp.f32 %v1603_v7 }
 0x13c   : > { %v2051_v9 = vpop.eup %2050  ;;  %2064 = vrcp.f32 %v1605_v8 }
 0x13d   : > { %v2053_v10 = vpop.eup %2052 }
 0x13e   : > { %v2055_v11 = vpop.eup %2054 }
 0x13f   : > { %v2057_v12 = vpop.eup %2056  ;;  %v1714_v13 = vcombine.low %v2051_v9, %v2055_v11 }
 0x140   : > { %v1715_v0 = vcombine.low %v2053_v10, %v2057_v12  ;;  %v2059_v14 = vpop.eup %2058 }
 0x141   : > { %1746 = vst [vmem:[%s2291_s20 + $0x60] sm:$0x77] %v1714_v13  ;;  %v2061_v15 = vpop.eup %2060 }
 0x142   : > { %1747 = vst [vmem:[%s2291_s20 + $0x68] sm:$0x77] %v1715_v0 }
 0x145   : > { %v2063_v17 = vpop.eup %2062 }
 0x146   : > { %v2065_v18 = vpop.eup %2064  ;;  %v1716_v19 = vcombine.low %v2059_v14, %v2063_v17 }
 0x147   : > { %v1717_v16 = vcombine.low %v2061_v15, %v2065_v18 }
 0x148   : > { %1748 = vst [vmem:[%s2291_s20 + $0x70] sm:$0x77] %v1716_v19 }
 0x149   : > { %1749 = vst [vmem:[%s2291_s20 + $0x78] sm:$0x77] %v1717_v16 }
 0x14a PF: > { %s12_s9 = sadd.s32 1, %s2072_s9  }
 0x14b   : > { %p9_p4 = scmp.ge.s32.totalorder %s12_s9, 4  }
 0x14d   :  { %11 = sbr.rel (!%p9_p4) target bundleno = 1 (0x1), region = 58 }

</bundles_post_ra>
